<compile_context>
chip_gen: v6e
topology: v6e:2x2x1
jax: 0.10.0
libtpu: 0.0.40
codegen_flags: <defaults>
</compile_context>

<pallas_src>
from functools import partial

import jax
import jax.numpy as jnp
from jax import lax
from jax.experimental import pallas as pl
from jax.experimental.pallas import tpu as pltpu


def _vmem_limit_bytes():
    """Generation-aware scoped-VMEM limit (v5e/v6e: 128 MiB phys, v7x: 64)."""
    try:
        cap = pltpu.get_tpu_info().vmem_capacity_bytes
    except Exception:
        return 64 * 1024 * 1024
    if cap <= 64 * 1024 * 1024:          # v7x: 64 MiB physical per TensorCore
        return 48 * 1024 * 1024
    return 96 * 1024 * 1024              # v5e / v6e: 128 MiB physical


def _pick_block_h(H, W, C):
    """Largest divisor of H whose band intermediates stay ~a few MiB."""
    target_rows = max(8, min(H, (2 * 1024 * 1024) // max(4 * W * 3 * C, 1)))
    for hb in range(min(H, target_rows), 0, -1):
        if H % hb == 0:
            return hb
    return H


def _conv3x3_prelu(a, w, alpha):
    """3x3 'same-in-W' conv + scalar PReLU on an H-pre-padded band.

    a:     (Hout + 2, W, C)   -- the 1-row H halo is already included.
    w:     (3, 3C, C)         -- dy-major; the 3 dx taps folded into K = 3C.
    Returns f32 (Hout, W, C).

    The dx band is built ONCE (hoisted out of the dy loop); the W zero padding
    is folded directly into the band construction, so no (H+2, W+2) padded
    copy and no sublane-misaligned W slices are ever materialized.
    """
    Hp, W, C = a.shape
    Hout = Hp - 2
    a = a.astype(w.dtype)                                  # bf16 matmul inputs
    zcol = jnp.zeros((Hp, 1, C), a.dtype)
    left = jnp.concatenate([zcol, a[:, : W - 1, :]], axis=1)   # tap x[:, w-1]
    right = jnp.concatenate([a[:, 1:, :], zcol], axis=1)       # tap x[:, w+1]
    band_full = jnp.concatenate([left, a, right], axis=-1)     # (Hp, W, 3C)

    acc = None
    for dy in range(3):
        band = band_full[dy:dy + Hout].reshape(Hout * W, 3 * C)
        part = jnp.dot(band, w[dy], preferred_element_type=jnp.float32)
        acc = part if acc is None else acc + part
    acc = acc.reshape(Hout, W, C)
    # PReLU with a single scalar parameter (num_parameters=1), in f32.
    return jnp.where(acc > 0, acc, alpha * acc)


def residual_block_kernel(alpha_ref, x_ref, w1_ref, w2_ref, out_ref, *, block_h):
    # alpha_ref: SMEM (2,) f32
    # x_ref:     (1, H + 4, W, C)  -- whole image, H pre-padded by 2 each side
    # w refs:    (3, 3C, C)        -- resident across the grid
    # out_ref:   (1, block_h, W, C)
    hb = pl.program_id(1)
    nb = pl.num_programs(1)
    r0 = pl.multiple_of(hb * block_h, block_h)

    # Input row-band with the 2-row halo needed by the two fused 3x3 convs.
    # The H zero padding is baked into x_ref, so no boundary special-casing.
    xb = x_ref[0, pl.ds(r0, block_h + 4), :, :]

    # Conv1 + PReLU1 over the band -> h rows [r0-1, r0+block_h+1).
    h = _conv3x3_prelu(xb, w1_ref[...], alpha_ref[0])       # (block_h+2, W, C)

    # Conv2's SAME padding pads h with ZEROS, so the halo rows of h that fall
    # outside the image (row -1 at the top band, row H at the bottom band)
    # must be zeroed rather than kept as convs over the x zero-padding.
    row = lax.broadcasted_iota(jnp.int32, (block_h + 2, 1, 1), 0)
    kill = jnp.logical_or(jnp.logical_and(hb == 0, row == 0),
                          jnp.logical_and(hb == nb - 1, row == block_h + 1))
    h = jnp.where(kill, 0.0, h)

    # Conv2 + PReLU2 -> y rows [r0, r0+block_h).
    y = _conv3x3_prelu(h, w2_ref[...], alpha_ref[1])        # (block_h, W, C)

    # Residual: re-read the input rows at store time (short live range; the
    # block is already resident in VMEM so the re-read is free).
    x_res = x_ref[0, pl.ds(r0 + 2, block_h), :, :]
    out_ref[0] = (x_res.astype(jnp.float32) + y).astype(out_ref.dtype)


def residual_block_pallas(x, w1, w2, a1, a2, *,
                          compute_dtype=jnp.bfloat16, block_h=None):
    """x: (N, H, W, C); w1, w2: (3, 3, C, C) HWIO; a1, a2: PReLU scalars."""
    N, H, W, C = x.shape
    if block_h is None:
        block_h = _pick_block_h(H, W, C)
    assert H % block_h == 0, (H, block_h)
    HB = H // block_h

    # 2-row H halo for the fused two convs, baked in once on the host side
    # (4 extra rows of HBM traffic; keeps the in-kernel band loads unclamped).
    xp = jnp.pad(x, ((0, 0), (2, 2), (0, 0), (0, 0)))

    # Fold the dx taps into the contraction dim once, in the wrapper; matmul
    # inputs go to compute_dtype (bf16), accumulation stays f32.
    w1r = w1.reshape(3, 3 * C, C).astype(compute_dtype)
    w2r = w2.reshape(3, 3 * C, C).astype(compute_dtype)
    alphas = jnp.stack([jnp.asarray(a1, jnp.float32),
                        jnp.asarray(a2, jnp.float32)])

    grid_spec = pltpu.PrefetchScalarGridSpec(
        num_scalar_prefetch=1,   # alphas -> SMEM, first kernel arg
        grid=(N, HB),            # band axis innermost: x DMA'd once per image
        in_specs=[
            # whole padded image; constant block index over the band axis so
            # it stays resident in VMEM while the bands are computed.
            pl.BlockSpec((1, H + 4, W, C), lambda n, hb, alphas: (n, 0, 0, 0)),
            pl.BlockSpec((3, 3 * C, C), lambda n, hb, alphas: (0, 0, 0)),
            pl.BlockSpec((3, 3 * C, C), lambda n, hb, alphas: (0, 0, 0)),
        ],
        out_specs=pl.BlockSpec((1, block_h, W, C),
                               lambda n, hb, alphas: (n, hb, 0, 0)),
    )
    kernel = partial(residual_block_kernel, block_h=block_h)
    return pl.pallas_call(
        kernel,
        out_shape=jax.ShapeDtypeStruct((N, H, W, C), x.dtype),
        grid_spec=grid_spec,
        compiler_params=pltpu.CompilerParams(
            dimension_semantics=("parallel", "parallel"),  # megacore sharding
            vmem_limit_bytes=_vmem_limit_bytes()),
    )(alphas, xp, w1r, w2r)


@partial(jax.jit, static_argnames=("compute_dtype", "block_h"))
def residual_block(x, w1, w2, a1, a2, *,
                   compute_dtype=jnp.bfloat16, block_h=None):
    return residual_block_pallas(x, w1, w2, a1, a2,
                                 compute_dtype=compute_dtype, block_h=block_h)


def residual_block_ref(x, w1, w2, a1, a2):
    """Pure-JAX reference for verification."""
    def cpa(z, w, a):
        y = lax.conv_general_dilated(
            z, w, window_strides=(1, 1), padding="SAME",
            dimension_numbers=("NHWC", "HWIO", "NHWC"))
        return jnp.where(y > 0, y, a * y)
    return x + cpa(cpa(x, w1, a1), w2, a2)


if __name__ == "__main__":
    key = jax.random.PRNGKey(0)
    k_x, k_w1, k_w2 = jax.random.split(key, 3)

    N, C, H, W = 2, 4, 16, 16
    # PyTorch module sees NCHW; transpose to the kernel's NHWC layout.
    x_nchw = jax.random.normal(k_x, (N, C, H, W), dtype=jnp.float32)
    x = jnp.transpose(x_nchw, (0, 2, 3, 1))  # NHWC

    # Conv weights in PyTorch OIHW = (C, C, 3, 3) -> HWIO (3, 3, Cin, Cout).
    w1_oihw = 0.1 * jax.random.normal(k_w1, (C, C, 3, 3), dtype=jnp.float32)
    w2_oihw = 0.1 * jax.random.normal(k_w2, (C, C, 3, 3), dtype=jnp.float32)
    w1 = jnp.transpose(w1_oihw, (2, 3, 1, 0))
    w2 = jnp.transpose(w2_oihw, (2, 3, 1, 0))

    # PReLU scalar parameters, PyTorch default init 0.25.
    a1 = 0.25
    a2 = 0.25

    ref = residual_block_ref(x, w1, w2, a1, a2)

    # Strict numerical check: f32 matmul inputs (exercises the row-band path).
    out_f32 = jax.block_until_ready(
        residual_block(x, w1, w2, a1, a2,
                       compute_dtype=jnp.float32, block_h=8))
    assert out_f32.shape == (N, H, W, C)
    assert jnp.allclose(out_f32, ref, atol=1e-4, rtol=1e-4), (
        float(jnp.max(jnp.abs(out_f32 - ref))))

    # Fast path: bf16 matmul inputs, f32 accumulation / PReLU / residual.
    out_bf16 = jax.block_until_ready(
        residual_block(x, w1, w2, a1, a2,
                       compute_dtype=jnp.bfloat16, block_h=8))
    assert jnp.allclose(out_bf16, ref, atol=1e-1, rtol=1e-1), (
        float(jnp.max(jnp.abs(out_bf16 - ref))))

    print("KERNEL_OK")
</pallas_src>

<mosaic_0001>
module attributes {stable_mosaic.version = 11 : i64} {
  func.func @residual_block_kernel(%arg0: i32, %arg1: i32, %arg2: memref<2xf32, #tpu.memory_space<smem>>, %arg3: memref<1x20x16x4xf32, #tpu.memory_space<vmem>>, %arg4: memref<3x12x4xf32, #tpu.memory_space<vmem>>, %arg5: memref<3x12x4xf32, #tpu.memory_space<vmem>>, %arg6: memref<1x8x16x4xf32, #tpu.memory_space<vmem>>) attributes {dimension_semantics = [#tpu.dimension_semantics<parallel>, #tpu.dimension_semantics<parallel>], iteration_bounds = array<i64: 2, 2>, scalar_prefetch = 1 : i64, scratch_operands = 0 : i64, tpu.core_type = #tpu.core_type<tc>, window_params = [{transform_indices = @transform_0, window_bounds = array<i64: 1, 20, 16, 4>}, {pipeline_mode = #tpu.pipeline_mode<synchronous>, transform_indices = @transform_1, window_bounds = array<i64: 3, 12, 4>}, {pipeline_mode = #tpu.pipeline_mode<synchronous>, transform_indices = @transform_2, window_bounds = array<i64: 3, 12, 4>}, {transform_indices = @transform_3, window_bounds = array<i64: 1, 8, 16, 4>}]} {
    %c8_i32 = arith.constant 8 : i32
    %0 = arith.muli %arg1, %c8_i32 : i32
    %1 = tpu.assume_multiple %0, 8 : i32
    %c0 = arith.constant 0 : index
    %2 = arith.index_cast %1 : i32 to index
    %c0_0 = arith.constant 0 : index
    %c0_1 = arith.constant 0 : index
    %3 = vector.load %arg3[%c0, %2, %c0_0, %c0_1] : memref<1x20x16x4xf32, #tpu.memory_space<vmem>>, vector<1x12x16x4xf32>
    %4 = vector.shape_cast %3 : vector<1x12x16x4xf32> to vector<12x16x4xf32>
    %c0_2 = arith.constant 0 : index
    %c0_3 = arith.constant 0 : index
    %c0_4 = arith.constant 0 : index
    %5 = vector.load %arg4[%c0_2, %c0_3, %c0_4] : memref<3x12x4xf32, #tpu.memory_space<vmem>>, vector<3x12x4xf32>
    %c0_5 = arith.constant 0 : index
    %6 = memref.load %arg2[%c0_5] : memref<2xf32, #tpu.memory_space<smem>>
    %cst = arith.constant 0.000000e+00 : f32
    %7 = vector.broadcast %cst : f32 to vector<12x1x4xf32>
    %8 = vector.extract_strided_slice %4 {offsets = [0, 0, 0], sizes = [12, 15, 4], strides = [1, 1, 1]} : vector<12x16x4xf32> to vector<12x15x4xf32>
    %9 = tpu.concatenate %7, %8 in 1 : vector<12x1x4xf32>, vector<12x15x4xf32> -> vector<12x16x4xf32>
    %10 = vector.extract_strided_slice %4 {offsets = [0, 1, 0], sizes = [12, 15, 4], strides = [1, 1, 1]} : vector<12x16x4xf32> to vector<12x15x4xf32>
    %11 = tpu.concatenate %10, %7 in 1 : vector<12x15x4xf32>, vector<12x1x4xf32> -> vector<12x16x4xf32>
    %12 = tpu.concatenate %9, %4, %11 in 2 : vector<12x16x4xf32>, vector<12x16x4xf32>, vector<12x16x4xf32> -> vector<12x16x12xf32>
    %13 = vector.extract_strided_slice %12 {offsets = [0, 0, 0], sizes = [10, 16, 12], strides = [1, 1, 1]} : vector<12x16x12xf32> to vector<10x16x12xf32>
    %14 = vector.shape_cast %13 : vector<10x16x12xf32> to vector<160x12xf32>
    %15 = vector.extract_strided_slice %5 {offsets = [0, 0, 0], sizes = [1, 12, 4], strides = [1, 1, 1]} : vector<3x12x4xf32> to vector<1x12x4xf32>
    %16 = vector.shape_cast %15 : vector<1x12x4xf32> to vector<12x4xf32>
    %cst_6 = arith.constant dense<0.000000e+00> : vector<160x4xf32>
    %17 = tpu.matmul %14, %16, %cst_6 {dimension_numbers = #tpu.dot_dimension_numbers<[1], [0], [0], [1], [0, 0, 1, 1], [], []>} : vector<160x12xf32>, vector<12x4xf32>, vector<160x4xf32> -> vector<160x4xf32>
    %18 = vector.extract_strided_slice %12 {offsets = [1, 0, 0], sizes = [10, 16, 12], strides = [1, 1, 1]} : vector<12x16x12xf32> to vector<10x16x12xf32>
    %19 = vector.shape_cast %18 : vector<10x16x12xf32> to vector<160x12xf32>
    %20 = vector.extract_strided_slice %5 {offsets = [1, 0, 0], sizes = [1, 12, 4], strides = [1, 1, 1]} : vector<3x12x4xf32> to vector<1x12x4xf32>
    %21 = vector.shape_cast %20 : vector<1x12x4xf32> to vector<12x4xf32>
    %cst_7 = arith.constant dense<0.000000e+00> : vector<160x4xf32>
    %22 = tpu.matmul %19, %21, %cst_7 {dimension_numbers = #tpu.dot_dimension_numbers<[1], [0], [0], [1], [0, 0, 1, 1], [], []>} : vector<160x12xf32>, vector<12x4xf32>, vector<160x4xf32> -> vector<160x4xf32>
    %23 = arith.addf %17, %22 : vector<160x4xf32>
    %24 = vector.extract_strided_slice %12 {offsets = [2, 0, 0], sizes = [10, 16, 12], strides = [1, 1, 1]} : vector<12x16x12xf32> to vector<10x16x12xf32>
    %25 = vector.shape_cast %24 : vector<10x16x12xf32> to vector<160x12xf32>
    %26 = vector.extract_strided_slice %5 {offsets = [2, 0, 0], sizes = [1, 12, 4], strides = [1, 1, 1]} : vector<3x12x4xf32> to vector<1x12x4xf32>
    %27 = vector.shape_cast %26 : vector<1x12x4xf32> to vector<12x4xf32>
    %cst_8 = arith.constant dense<0.000000e+00> : vector<160x4xf32>
    %28 = tpu.matmul %25, %27, %cst_8 {dimension_numbers = #tpu.dot_dimension_numbers<[1], [0], [0], [1], [0, 0, 1, 1], [], []>} : vector<160x12xf32>, vector<12x4xf32>, vector<160x4xf32> -> vector<160x4xf32>
    %29 = arith.addf %23, %28 : vector<160x4xf32>
    %30 = vector.shape_cast %29 : vector<160x4xf32> to vector<10x16x4xf32>
    %cst_9 = arith.constant 0.000000e+00 : f32
    %31 = vector.broadcast %cst_9 : f32 to vector<10x16x4xf32>
    %32 = arith.cmpf ogt, %30, %31 : vector<10x16x4xf32>
    %33 = vector.broadcast %6 : f32 to vector<10x16x4xf32>
    %34 = arith.mulf %33, %30 : vector<10x16x4xf32>
    %35 = arith.select %32, %30, %34 : vector<10x16x4xi1>, vector<10x16x4xf32>
    %36 = tpu.iota {dimensions = array<i32: 0>} : vector<10x1x1xi32>
    %c0_i32 = arith.constant 0 : i32
    %37 = arith.cmpi eq, %arg1, %c0_i32 : i32
    %c0_i32_10 = arith.constant 0 : i32
    %38 = vector.broadcast %c0_i32_10 : i32 to vector<10x1x1xi32>
    %39 = arith.cmpi eq, %36, %38 : vector<10x1x1xi32>
    %40 = vector.broadcast %37 : i1 to vector<10x1x1xi1>
    %41 = arith.andi %40, %39 : vector<10x1x1xi1>
    %c1_i32 = arith.constant 1 : i32
    %42 = arith.cmpi eq, %arg1, %c1_i32 : i32
    %c9_i32 = arith.constant 9 : i32
    %43 = vector.broadcast %c9_i32 : i32 to vector<10x1x1xi32>
    %44 = arith.cmpi eq, %36, %43 : vector<10x1x1xi32>
    %45 = vector.broadcast %42 : i1 to vector<10x1x1xi1>
    %46 = arith.andi %45, %44 : vector<10x1x1xi1>
    %47 = arith.ori %41, %46 : vector<10x1x1xi1>
    %cst_11 = arith.constant 0.000000e+00 : f32
    %48 = vector.shape_cast %47 : vector<10x1x1xi1> to vector<10x1x1xi1>
    %49 = vector.broadcast %48 : vector<10x1x1xi1> to vector<10x16x4xi1>
    %50 = vector.broadcast %cst_11 : f32 to vector<10x16x4xf32>
    %51 = arith.select %49, %50, %35 : vector<10x16x4xi1>, vector<10x16x4xf32>
    %c0_12 = arith.constant 0 : index
    %c0_13 = arith.constant 0 : index
    %c0_14 = arith.constant 0 : index
    %52 = vector.load %arg5[%c0_12, %c0_13, %c0_14] : memref<3x12x4xf32, #tpu.memory_space<vmem>>, vector<3x12x4xf32>
    %c1 = arith.constant 1 : index
    %53 = memref.load %arg2[%c1] : memref<2xf32, #tpu.memory_space<smem>>
    %cst_15 = arith.constant 0.000000e+00 : f32
    %54 = vector.broadcast %cst_15 : f32 to vector<10x1x4xf32>
    %55 = vector.extract_strided_slice %51 {offsets = [0, 0, 0], sizes = [10, 15, 4], strides = [1, 1, 1]} : vector<10x16x4xf32> to vector<10x15x4xf32>
    %56 = tpu.concatenate %54, %55 in 1 : vector<10x1x4xf32>, vector<10x15x4xf32> -> vector<10x16x4xf32>
    %57 = vector.extract_strided_slice %51 {offsets = [0, 1, 0], sizes = [10, 15, 4], strides = [1, 1, 1]} : vector<10x16x4xf32> to vector<10x15x4xf32>
    %58 = tpu.concatenate %57, %54 in 1 : vector<10x15x4xf32>, vector<10x1x4xf32> -> vector<10x16x4xf32>
    %59 = tpu.concatenate %56, %51, %58 in 2 : vector<10x16x4xf32>, vector<10x16x4xf32>, vector<10x16x4xf32> -> vector<10x16x12xf32>
    %60 = vector.extract_strided_slice %59 {offsets = [0, 0, 0], sizes = [8, 16, 12], strides = [1, 1, 1]} : vector<10x16x12xf32> to vector<8x16x12xf32>
    %61 = vector.shape_cast %60 : vector<8x16x12xf32> to vector<128x12xf32>
    %62 = vector.extract_strided_slice %52 {offsets = [0, 0, 0], sizes = [1, 12, 4], strides = [1, 1, 1]} : vector<3x12x4xf32> to vector<1x12x4xf32>
    %63 = vector.shape_cast %62 : vector<1x12x4xf32> to vector<12x4xf32>
    %cst_16 = arith.constant dense<0.000000e+00> : vector<128x4xf32>
    %64 = tpu.matmul %61, %63, %cst_16 {dimension_numbers = #tpu.dot_dimension_numbers<[1], [0], [0], [1], [0, 0, 1, 1], [], []>} : vector<128x12xf32>, vector<12x4xf32>, vector<128x4xf32> -> vector<128x4xf32>
    %65 = vector.extract_strided_slice %59 {offsets = [1, 0, 0], sizes = [8, 16, 12], strides = [1, 1, 1]} : vector<10x16x12xf32> to vector<8x16x12xf32>
    %66 = vector.shape_cast %65 : vector<8x16x12xf32> to vector<128x12xf32>
    %67 = vector.extract_strided_slice %52 {offsets = [1, 0, 0], sizes = [1, 12, 4], strides = [1, 1, 1]} : vector<3x12x4xf32> to vector<1x12x4xf32>
    %68 = vector.shape_cast %67 : vector<1x12x4xf32> to vector<12x4xf32>
    %cst_17 = arith.constant dense<0.000000e+00> : vector<128x4xf32>
    %69 = tpu.matmul %66, %68, %cst_17 {dimension_numbers = #tpu.dot_dimension_numbers<[1], [0], [0], [1], [0, 0, 1, 1], [], []>} : vector<128x12xf32>, vector<12x4xf32>, vector<128x4xf32> -> vector<128x4xf32>
    %70 = arith.addf %64, %69 : vector<128x4xf32>
    %71 = vector.extract_strided_slice %59 {offsets = [2, 0, 0], sizes = [8, 16, 12], strides = [1, 1, 1]} : vector<10x16x12xf32> to vector<8x16x12xf32>
    %72 = vector.shape_cast %71 : vector<8x16x12xf32> to vector<128x12xf32>
    %73 = vector.extract_strided_slice %52 {offsets = [2, 0, 0], sizes = [1, 12, 4], strides = [1, 1, 1]} : vector<3x12x4xf32> to vector<1x12x4xf32>
    %74 = vector.shape_cast %73 : vector<1x12x4xf32> to vector<12x4xf32>
    %cst_18 = arith.constant dense<0.000000e+00> : vector<128x4xf32>
    %75 = tpu.matmul %72, %74, %cst_18 {dimension_numbers = #tpu.dot_dimension_numbers<[1], [0], [0], [1], [0, 0, 1, 1], [], []>} : vector<128x12xf32>, vector<12x4xf32>, vector<128x4xf32> -> vector<128x4xf32>
    %76 = arith.addf %70, %75 : vector<128x4xf32>
    %77 = vector.shape_cast %76 : vector<128x4xf32> to vector<8x16x4xf32>
    %cst_19 = arith.constant 0.000000e+00 : f32
    %78 = vector.broadcast %cst_19 : f32 to vector<8x16x4xf32>
    %79 = arith.cmpf ogt, %77, %78 : vector<8x16x4xf32>
    %80 = vector.broadcast %53 : f32 to vector<8x16x4xf32>
    %81 = arith.mulf %80, %77 : vector<8x16x4xf32>
    %82 = arith.select %79, %77, %81 : vector<8x16x4xi1>, vector<8x16x4xf32>
    %c2_i32 = arith.constant 2 : i32
    %83 = arith.addi %1, %c2_i32 : i32
    %c0_20 = arith.constant 0 : index
    %84 = arith.index_cast %83 : i32 to index
    %c0_21 = arith.constant 0 : index
    %c0_22 = arith.constant 0 : index
    %85 = vector.load %arg3[%c0_20, %84, %c0_21, %c0_22] : memref<1x20x16x4xf32, #tpu.memory_space<vmem>>, vector<1x8x16x4xf32>
    %86 = vector.shape_cast %85 : vector<1x8x16x4xf32> to vector<8x16x4xf32>
    %87 = arith.addf %86, %82 : vector<8x16x4xf32>
    %c0_23 = arith.constant 0 : index
    %c0_24 = arith.constant 0 : index
    %c0_25 = arith.constant 0 : index
    %c0_26 = arith.constant 0 : index
    %88 = vector.load %arg6[%c0_23, %c0_24, %c0_25, %c0_26] : memref<1x8x16x4xf32, #tpu.memory_space<vmem>>, vector<1x8x16x4xf32>
    %89 = vector.shape_cast %88 : vector<1x8x16x4xf32> to vector<8x16x4xf32>
    %90 = vector.shape_cast %87 : vector<8x16x4xf32> to vector<1x8x16x4xf32>
    tpu.vector_store %arg6[%c0_23, %c0_24, %c0_25, %c0_26], %90 {strides = array<i32>} : memref<1x8x16x4xf32, #tpu.memory_space<vmem>>, vector<1x8x16x4xf32>,
    return
  }
  func.func @transform_0(%arg0: i32, %arg1: i32, %arg2: memref<2xf32, #tpu.memory_space<smem>>) -> (i32, i32, i32, i32) {
    %c0_i32 = arith.constant 0 : i32
    %c0_i32_0 = arith.constant 0 : i32
    %c0_i32_1 = arith.constant 0 : i32
    %c0_i32_2 = arith.constant 0 : i32
    return %arg0, %c0_i32, %c0_i32_0, %c0_i32_1 : i32, i32, i32, i32
  }
  func.func @transform_1(%arg0: i32, %arg1: i32, %arg2: memref<2xf32, #tpu.memory_space<smem>>) -> (i32, i32, i32) {
    %c0_i32 = arith.constant 0 : i32
    %c0_i32_0 = arith.constant 0 : i32
    %c0_i32_1 = arith.constant 0 : i32
    %c0_i32_2 = arith.constant 0 : i32
    return %c0_i32, %c0_i32_0, %c0_i32_1 : i32, i32, i32
  }
  func.func @transform_2(%arg0: i32, %arg1: i32, %arg2: memref<2xf32, #tpu.memory_space<smem>>) -> (i32, i32, i32) {
    %c0_i32 = arith.constant 0 : i32
    %c0_i32_0 = arith.constant 0 : i32
    %c0_i32_1 = arith.constant 0 : i32
    %c0_i32_2 = arith.constant 0 : i32
    return %c0_i32, %c0_i32_0, %c0_i32_1 : i32, i32, i32
  }
  func.func @transform_3(%arg0: i32, %arg1: i32, %arg2: memref<2xf32, #tpu.memory_space<smem>>) -> (i32, i32, i32, i32) {
    %c0_i32 = arith.constant 0 : i32
    %c0_i32_0 = arith.constant 0 : i32
    %c0_i32_1 = arith.constant 0 : i32
    return %arg0, %arg1, %c0_i32, %c0_i32_0 : i32, i32, i32, i32
  }
}

</mosaic_0001>

<bundles_post_ra>
// kernel: residual_block.1
= control target key start
LH: loop header
LB: loop body
LE: loop exit
PB: predicated region body
PF: predicated region fallthrough
CT: control target
= control target key end

     0   :  { %s4070_s0 = inlined_call_operand.vmem [shape: f32[2], index: 0, kind: input, shape index: {}]   ;;  %s4071_s1 = inlined_call_operand.vmem [shape: f32[2,20,16,4], index: 1, kind: input, shape index: {}]   ;;  %s4072_s2 = inlined_call_operand.vmem [shape: f32[3,12,4], index: 2, kind: input, shape index: {}]   ;;  %s4073_s3 = inlined_call_operand.vmem [shape: f32[3,12,4], index: 3, kind: input, shape index: {}]   ;;  %s4074_s4 = inlined_call_operand.vmem [shape: f32[2,16,16,4], index: 4, kind: output, shape index: {}]  }
   0x1   :  { %s9_s17 = sshll.u32 %s4070_s0, 4  ;;  %s10_s17 = int_to_ptr.vmem [resolvable:$true] %s9_s17 }
   0x2   :  { %s2818_s18 = scalar_lea.vmem %s10_s17, 16  ;;  %p2823_p1 = scmp.lt.s32.totalorder %s10_s17, %s10_s17 }
   0x3   :  { %p2819_p0 = scmp.ne.s32.totalorder %s10_s17, %s2818_s18  ;;  %p2824_p2 = scmp.lt.s32.totalorder %s2818_s18, %s2818_s18 }
   0x5   :  { %p2825_p3 = por %p2824_p2, %p2823_p1 }
   0x7   :  { %p2826_p4 = pnand %p2825_p3, %p2819_p0 }
   0x9   :  { %2829 = shalt.err (!%p2826_p4)  }
   0xa   :  { %s2872_s19 = smov [#allocation3]  }
   0xb   :  { %12 = dma.vmem_to_smem %s10_s17, 16, %s2872_s19, [#allocation2] }
   0xc   :  { %2850 = dma.done.wait [#allocation2], 16 }
   0xd   :  { %2851 = vsyncadd [#allocation2], 4294967280 }
   0xe   :  { %14 = sfence }
   0xf   :  { %s2903_s20 = smov 0   ;;  %s2905_s21 = smov 0  }
  0x10   :  { %s2907_s22 = smov 0   ;;  %s2909_s0 = smov 0  }
  0x11   :  { %s2911_s23 = smov 0  }
  0x12 LB: > { %s29_s24 = sadd.s32 1, %s2862_s22  ;;  %s32_s25 = sadd.s32 1, %s2866_s0  ;;  %s2870_s23 = sphi %s2911_s23, %s20_s23   ;;  %s2866_s0 = sphi %s2909_s0, %s4082_s0   ;;  %s2862_s22 = sphi %s2907_s22, %s4081_s22   ;;  %s2858_s21 = sphi %s2905_s21, %s4080_s21   ;;  %s2854_s20 = sphi %s2903_s20, %s4079_s20  }
  0x13   : > { %p30_p5 = scmp.ge.s32.totalorder %s29_s24, 2  ;;  %p2319_p6 = scmp.ge.s32.totalorder %s2870_s23, 1 }
  0x14   : > { %p158_p7 = scmp.lt.s32.totalorder %s2870_s23, 5 }
  0x15   : > { %s4084_s24 = smov (%p30_p5, %s29_s24), 0  ;;  %s4086_s25 = smov (!%p30_p5, %s32_s25), %s2866_s0 }
  0x16   : > { %p159_p8 = pnand %p2319_p6, %p158_p7  ;;  %p34_p9 = scmp.ge.s32.totalorder %s4086_s25, 2 }
  0x17   : > { %p187_p10 = scmp.lt.s32.totalorder (!%p159_p8), %s2858_s21, 1  ;;  %s2462_s5 = sshll.u32 (!%p159_p8), %s2854_s20, 7 }
  0x18   : > { %s4088_s25 = smov (%p34_p9, %s4086_s25), 0  ;;  %162 = sbr.rel (%p159_p8) target bundleno = 858 (0x35a), region = 32 }
  0x19   : > { %s2873_s10 = smov (!%p159_p8), 4   ;;  %s2874_s11 = smov (!%p159_p8), 8  }
  0x1a   : > { %p1260_p11 = scmp.eq.s32.totalorder (!%p159_p8), %s2854_s20, 0  ;;  %s236_s28 = sld [smem:[#allocation3]] (!%p159_p8) }
  0x1b   : > { %p1264_p12 = scmp.eq.s32.totalorder (!%p159_p8), %s2854_s20, 1  ;;  %s2321_s16 = sshll.u32 (!%p159_p8), %s2854_s20, 3 }
  0x1c   : > { %p195_p13 = scmp.lt.s32.totalorder (!%p159_p8), %s2321_s16, 15  ;;  %s2390_s17 = sld [smem:[#allocation3 + $0x1]] (!%p159_p8) }
  0x1d   : > { %vm662_vm0 = vcmask 1043456   ;;  %v233_v0 = vld [vmem:[%s4072_s2 + $0x18] sm:$0xf]  ;;  %s4090_s21 = smov (!%p187_p10, %s2858_s21), 1  ;;  %v232_v1 = vld [vmem:[%s4072_s2 + $0x10] sm:$0xff]  ;;  %vm334_vm1 = vcmask 1046528  }
  0x1e   : > { %2584 = vmatprep.subr.msk.mxu0 %vm662_vm0, %v233_v0  ;;  %2770 = vmatprep.subr.msk.mxu1 %vm662_vm0, %v233_v0  ;;  %s2774_s30 = smul.u32 320, %s4090_s21  ;;  %vm261_vm2 = vcmask 1040384   ;;  %v3065_v57 = vld [vmem:[%s4072_s2 + $0x28] sm:$0xf]  ;;  %vm551_vm3 = vcmask 31744   ;;  %vm576_vm4 = vcmask 64512  }
  0x1f   : > { %2585 = vmatpush3.msk.msra.mxu0 %vm662_vm0, %v233_v0  ;;  %2772 = vmatpush3.msk.msra.mxu1 %vm662_vm0, %v233_v0  ;;  %vm601_vm5 = vcmask 97280   ;;  %s1261_s29 = scalar_select %p1260_p11, 1, 0 }
  0x20   : > { %2586 = vmatprep.subr.mxu0 %v232_v1  ;;  %2771 = vmatprep.subr.mxu1 %v232_v1  ;;  %s191_s8 = scalar_lea.vmem %s4071_s1, %s2774_s30  ;;  %s4092_s16 = smov (!%p195_p13, %s2321_s16), 15 }
  0x21   : > { %2587 = vmatpush3.msra.mxu0 %v232_v1  ;;  %2773 = vmatpush3.msra.mxu1 %v232_v1  ;;  %s2952_s9 = scalar_lea.vmem %s191_s8, %s2462_s5  ;;  %s2322_s18 = sshll.u32 %s4092_s16, 1 }
  0x22   : > { %v211_v2 = vld [vmem:[%s2952_s9 + $0x28] sm:$0xff]  ;;  %v2956_v3 = vld [vmem:[%s2952_s9 + $0x10] sm:$0xff]  ;;  %v209_v4 = vld [vmem:[%s2952_s9 + $0x18] sm:$0xff]  ;;  %2652 = vmatprep.subr.msk.mxu0 %vm662_vm0, %v3065_v57  ;;  %s3546_s13 = scalar_select %p1264_p12, 1, 0 }
  0x23   : > { %405 = vrot.lane.b32.xlu1 %v211_v2, %s2873_s10  ;;  %399 = vrot.lane.b32.xlu0 %v2956_v3, %s2873_s10  ;;  %v338_v5 = vrot.slane %v2956_v3, 1  ;;  %v339_v6 = vrot.slane %v209_v4, 1  ;;  %v2964_v7 = vld [vmem:[%s2952_s9 + $0x20] sm:$0xff]  ;;  %v342_v9 = vrot.slane %v211_v2, 1  ;;  %v2977_v14 = vld [vmem:[%s2952_s9 + $0x30] sm:$0xff]  ;;  %v269_v16 = vrot.slane %v211_v2, 7 }
  0x24   : > { %v341_v10 = vrot.slane %v2964_v7, 1  ;;  %v213_v15 = vld [vmem:[%s2952_s9 + $0x38] sm:$0xff]  ;;  %v266_v17 = vrot.slane %v209_v4, 7  ;;  %v268_v18 = vrot.slane %v2964_v7, 7  ;;  %v344_v19 = vrot.slane %v2977_v14, 1  ;;  %v2985_v21 = vld [vmem:[%s2952_s9 + $0x40] sm:$0xff] }
  0x25   : > { %v340_v8 = vsel %vm334_vm1, %v338_v5, %v339_v6  ;;  %v384_v11 = vsel %vm334_vm1, %v339_v6, 0.0  ;;  %v385_v13 = vsel %vm334_vm1, %v342_v9, 0.0  ;;  %v345_v20 = vrot.slane %v213_v15, 1  ;;  %v215_v25 = vld [vmem:[%s2952_s9 + $0x48] sm:$0xff]  ;;  %v2991_v26 = vld [vmem:[%s2952_s9 + $0x50] sm:$0xff]  ;;  %v217_v27 = vld [vmem:[%s2952_s9 + $0x58] sm:$0xff] }
  0x26   : > { %v343_v12 = vsel %vm334_vm1, %v341_v10, %v342_v9  ;;  %v265_v22 = vrot.slane %v2956_v3, 7  ;;  %v271_v23 = vrot.slane %v2977_v14, 7  ;;  %v272_v24 = vrot.slane %v213_v15, 7  ;;  %v3030_v41 = vld [vmem:[%s2952_s9 + $0x60] sm:$0xff]  ;;  %v219_v42 = vld [vmem:[%s2952_s9 + $0x68] sm:$0xff]  ;;  %v3048_v50 = vld [vmem:[%s2952_s9 + $0x70] sm:$0xff] }
  0x27   : > { %401 = vrot.lane.b32.xlu0 %v209_v4, %s2873_s10  ;;  %483 = vrot.lane.b32.xlu1 %v340_v8, %s2874_s11  ;;  %v274_v28 = vrot.slane %v2985_v21, 7  ;;  %v275_v29 = vrot.slane %v215_v25, 7  ;;  %v277_v30 = vrot.slane %v2991_v26, 7  ;;  %v278_v31 = vrot.slane %v217_v27, 7  ;;  %v221_v51 = vld [vmem:[%s2952_s9 + $0x78] sm:$0xff]  ;;  %v3073_v60 = vld [vmem:[%s2952_s9 + $0x80] sm:$0xff] }
  0x28   : > { %v3002_v32 = vsel %vm261_vm2, %v268_v18, %v269_v16  ;;  %v3007_v33 = vsel %vm261_vm2, %v265_v22, %v266_v17  ;;  %v346_v34 = vsel %vm334_vm1, %v344_v19, %v345_v20  ;;  %v386_v35 = vsel %vm334_vm1, %v345_v20, 0.0  ;;  %v223_v61 = vld [vmem:[%s2952_s9 + $0x88] sm:$0xff]  ;;  %v3095_v9 = vld [vmem:[%s2952_s9 + $0xa0] sm:$0xff]  ;;  %v225_v17 = vld [vmem:[%s2952_s9 + $0x98] sm:$0xff]  ;;  %s2323_s19 = sshll.u32 %s4090_s21, 5 }
  0x29   : > { %v3014_v36 = vsel %vm261_vm2, %v271_v23, %v272_v24  ;;  %v3019_v37 = vsel %vm261_vm2, %v274_v28, %v275_v29  ;;  %v3024_v38 = vsel %vm261_vm2, %v277_v30, %v278_v31  ;;  %v347_v39 = vrot.slane %v2985_v21, 1  ;;  %v227_v6 = vld [vmem:[%s2952_s9 + $0xa8] sm:$0xff]  ;;  %v3113_v20 = vld [vmem:[%s2952_s9 + $0x90] sm:$0xff]  ;;  %s199_s20 = sadd.s32 %s2323_s19, %s2322_s18 }
  0x2a   : > { %v348_v40 = vrot.slane %v215_v25, 1  ;;  %v280_v43 = vrot.slane %v3030_v41, 7  ;;  %v281_v44 = vrot.slane %v219_v42, 7  ;;  %v350_v48 = vrot.slane %v2991_v26, 1  ;;  %s2324_s26 = sshll.u32 %s199_s20, 3 }
  0x2b   : > { %403 = vrot.lane.b32.xlu0 %v2964_v7, %s2873_s10  ;;  %485 = vrot.lane.b32.xlu1 %v384_v11, %s2874_s11  ;;  %v351_v49 = vrot.slane %v217_v27, 1  ;;  %v283_v52 = vrot.slane %v3048_v50, 7  ;;  %v284_v53 = vrot.slane %v221_v51, 7  ;;  %v353_v58 = vrot.slane %v3030_v41, 1 }
  0x2c   : > { %v349_v45 = vsel %vm334_vm1, %v347_v39, %v348_v40  ;;  %v387_v46 = vsel %vm334_vm1, %v348_v40, 0.0  ;;  %v3042_v47 = vsel %vm261_vm2, %v280_v43, %v281_v44  ;;  %v354_v59 = vrot.slane %v219_v42, 1  ;;  %v3136_v39 = vld [vmem:[%s4072_s2 + $0x8] sm:$0xf] }
  0x2d   : > { %v352_v54 = vsel %vm334_vm1, %v350_v48, %v351_v49  ;;  %v388_v55 = vsel %vm334_vm1, %v351_v49, 0.0  ;;  %v3060_v56 = vsel %vm261_vm2, %v283_v52, %v284_v53  ;;  %v286_v62 = vrot.slane %v3073_v60, 7  ;;  %2618 = vmatprep.subr.msk.mxu1 %vm662_vm0, %v3136_v39  ;;  %v3149_v48 = vld [vmem:[%s2952_s9 + $0x8] sm:$0xff] }
  0x2e   : > { %v287_v63 = vrot.slane %v223_v61, 7  ;;  %v355_v0 = vsel %vm334_vm1, %v353_v58, %v354_v59  ;;  %v389_v1 = vsel %vm334_vm1, %v354_v59, 0.0  ;;  %v356_v4 = vrot.slane %v3048_v50, 1  ;;  %v3163_v58 = vld [vmem:[%s2952_s9 + $0xb0] sm:$0xff]  ;;  %v3166_v59 = vld [vmem:[%s2952_s9 + $0xb8] sm:$0xff] }
  0x2f   : > { %487 = vrot.lane.b32.xlu0 %v343_v12, %s2874_s11  ;;  %489 = vrot.lane.b32.xlu1 %v385_v13, %s2874_s11  ;;  %v357_v5 = vrot.slane %v221_v51, 1  ;;  %v293_v8 = vrot.slane %v227_v6, 7  ;;  %v292_v12 = vrot.slane %v3095_v9, 7  ;;  %v360_v16 = vrot.slane %v223_v61, 1 }
  0x30   : > { %v3085_v2 = vsel %vm261_vm2, %v286_v62, %v287_v63  ;;  %v290_v19 = vrot.slane %v225_v17, 7  ;;  %v365_v29 = vrot.slane %v3095_v9, 1  ;;  %v362_v40 = vrot.slane %v3113_v20, 1 }
  0x31   : > { %v358_v10 = vsel %vm334_vm1, %v356_v4, %v357_v5  ;;  %v390_v11 = vsel %vm334_vm1, %v357_v5, 0.0  ;;  %v3103_v13 = vsel %vm261_vm2, %v292_v12, %v293_v8  ;;  %v391_v31 = vsel %vm334_vm1, %v360_v16, 0.0 }
  0x32   : > { %v363_v44 = vrot.slane %v225_v17, 1  ;;  %v336_v53 = vrot.slane %v3149_v48, 1  ;;  %v369_v63 = vrot.slane %v3166_v59, 1  ;;  %v324_v3 = vsel %vm261_vm2, 0.0, %v268_v18 }
  0x33   : > { %407 = vrot.lane.b32.xlu0 %v2977_v14, %s2873_s10  ;;  %409 = vrot.lane.b32.xlu1 %v213_v15, %s2873_s10  ;;  %v359_v15 = vrot.slane %v3073_v60, 1 }
  0x35   : > { %v361_v24 = vsel %vm334_vm1, %v359_v15, %v360_v16 }
  0x37   : > { %491 = vrot.lane.b32.xlu0 %v346_v34, %s2874_s11  ;;  %493 = vrot.lane.b32.xlu1 %v386_v35, %s2874_s11  ;;  %v366_v34 = vrot.slane %v227_v6, 1 }
  0x39   : > { %v367_v35 = vsel %vm334_vm1, %v365_v29, %v366_v34 }
  0x3b   : > { %411 = vrot.lane.b32.xlu0 %v2985_v21, %s2873_s10  ;;  %413 = vrot.lane.b32.xlu1 %v215_v25, %s2873_s10  ;;  %v289_v25 = vrot.slane %v3113_v20, 7 }
  0x3f   : > { %495 = vrot.lane.b32.xlu0 %v349_v45, %s2874_s11  ;;  %497 = vrot.lane.b32.xlu1 %v387_v46, %s2874_s11  ;;  %v364_v45 = vsel %vm334_vm1, %v362_v40, %v363_v44  ;;  %v3146_v46 = vld [vmem:[%s2952_s9] sm:$0xff] }
  0x40   : > { %v335_v49 = vrot.slane %v3146_v46, 1 }
  0x43   : > { %415 = vrot.lane.b32.xlu0 %v2991_v26, %s2873_s10  ;;  %417 = vrot.lane.b32.xlu1 %v217_v27, %s2873_s10  ;;  %v3120_v27 = vsel %vm261_vm2, %v289_v25, %v290_v19 }
  0x47   : > { %499 = vrot.lane.b32.xlu0 %v352_v54, %s2874_s11  ;;  %501 = vrot.lane.b32.xlu1 %v388_v55, %s2874_s11  ;;  %v383_v54 = vsel %vm334_vm1, %v336_v53, 0.0  ;;  %v337_v55 = vsel %vm334_vm1, %v335_v49, %v336_v53 }
  0x4b   : > { %419 = vrot.lane.b32.xlu0 %v3030_v41, %s2873_s10  ;;  %421 = vrot.lane.b32.xlu1 %v219_v42, %s2873_s10  ;;  %v393_v42 = vsel %vm334_vm1, %v366_v34, 0.0 }
  0x4f   : > { %503 = vrot.lane.b32.xlu0 %v355_v0, %s2874_s11  ;;  %505 = vrot.lane.b32.xlu1 %v389_v1, %s2874_s11  ;;  %v394_v1 = vsel %vm334_vm1, %v369_v63, 0.0 }
  0x53   : > { %423 = vrot.lane.b32.xlu0 %v3048_v50, %s2873_s10  ;;  %425 = vrot.lane.b32.xlu1 %v221_v51, %s2873_s10  ;;  %v392_v51 = vsel %vm334_vm1, %v363_v44, 0.0 }
  0x57   : > { %507 = vrot.lane.b32.xlu0 %v358_v10, %s2874_s11  ;;  %509 = vrot.lane.b32.xlu1 %v390_v11, %s2874_s11 }
  0x5b   : > { %427 = vrot.lane.b32.xlu0 %v3073_v60, %s2873_s10  ;;  %429 = vrot.lane.b32.xlu1 %v223_v61, %s2873_s10  ;;  %v368_v61 = vrot.slane %v3163_v58, 1  ;;  %v332_v60 = vsel %vm261_vm2, 0.0, %v292_v12 }
  0x5d   : > { %v370_v0 = vsel %vm334_vm1, %v368_v61, %v369_v63 }
  0x5f   : > { %511 = vrot.lane.b32.xlu0 %v361_v24, %s2874_s11  ;;  %435 = vrot.lane.b32.xlu1 %v3095_v9, %s2873_s10  ;;  %v234_v24 = vld [vmem:[%s4072_s2 + $0x20] sm:$0xff] }
  0x63   : > { %513 = vrot.lane.b32.xlu0 %v391_v31, %s2874_s11  ;;  %437 = vrot.lane.b32.xlu1 %v227_v6, %s2873_s10  ;;  %v323_v6 = vsel %vm261_vm2, 0.0, %v265_v22 }
  0x67   : > { %519 = vrot.lane.b32.xlu0 %v367_v35, %s2874_s11  ;;  %431 = vrot.lane.b32.xlu1 %v3113_v20, %s2873_s10  ;;  %v325_v35 = vsel %vm261_vm2, 0.0, %v271_v23  ;;  %v262_v20 = vrot.slane %v3146_v46, 7 }
  0x6b   : > { %521 = vrot.lane.b32.xlu0 %v393_v42, %s2874_s11  ;;  %433 = vrot.lane.b32.xlu1 %v225_v17, %s2873_s10 }
  0x6f   : > { %515 = vrot.lane.b32.xlu0 %v364_v45, %s2874_s11  ;;  %395 = vrot.lane.b32.xlu1 %v3146_v46, %s2873_s10 }
  0x73   : > { %517 = vrot.lane.b32.xlu0 %v392_v51, %s2874_s11  ;;  %397 = vrot.lane.b32.xlu1 %v3149_v48, %s2873_s10 }
  0x77   : > { %481 = vrot.lane.b32.xlu1 %v383_v54, %s2874_s11  ;;  %479 = vrot.lane.b32.xlu0 %v337_v55, %s2874_s11 }
  0x7b   : > { %439 = vrot.lane.b32.xlu0 %v3163_v58, %s2873_s10  ;;  %441 = vrot.lane.b32.xlu1 %v3166_v59, %s2873_s10 }
  0x7f   : > { %523 = vrot.lane.b32.xlu0 %v370_v0, %s2874_s11  ;;  %525 = vrot.lane.b32.xlu1 %v394_v1, %s2874_s11 }
  0x95   : > { %v406_v4 = vpop.permute.xlu1 %405  ;;  %v400_v5 = vpop.permute.xlu0 %399 }
  0x96   : > { %v554_v8 = vsel %vm551_vm3, %v323_v6, %v400_v5 }
  0x99   : > { %v402_v10 = vpop.permute.xlu0 %401  ;;  %v484_v11 = vpop.permute.xlu1 %483 }
  0x9a   : > { %v3185_v15 = vsel %vm576_vm4, %v554_v8, %v484_v11  ;;  %v555_v16 = vsel %vm551_vm3, %v3007_v33, %v402_v10  ;;  %v557_v33 = vsel %vm551_vm3, %v3002_v32, %v406_v4 }
  0x9b   : > { %2588 = vmatprep.mubr.msk.f32.mxu0 %vm601_vm5, %v3185_v15 }
  0x9d   : > { %v404_v17 = vpop.permute.xlu0 %403  ;;  %v486_v19 = vpop.permute.xlu1 %485 }
  0x9e   : > { %v3195_v22 = vsel %vm576_vm4, %v555_v16, %v486_v19  ;;  %v556_v7 = vsel %vm551_vm3, %v324_v3, %v404_v17 }
  0x9f   : > { %2589 = vmatmul.mubr.msk.f32.vlgmr.msra.gmra.mxu0 %vm601_vm5, %v3195_v22 }
  0xa0   : > { %2653 = vmatpush3.msk.msra.mxu0 %vm662_vm0, %v3065_v57 }
  0xa1   : > { %v488_v29 = vpop.permute.xlu0 %487  ;;  %v490_v18 = vpop.permute.xlu1 %489  ;;  %2654 = vmatprep.subr.mxu0 %v234_v24 }
  0xa2   : > { %v3208_v31 = vsel %vm576_vm4, %v556_v7, %v488_v29  ;;  %v3211_v34 = vsel %vm576_vm4, %v557_v33, %v490_v18  ;;  %2655 = vmatpush3.msra.mxu0 %v234_v24 }
  0xa3   : > { %2591 = vmatprep.mubr.msk.f32.mxu0 %vm601_vm5, %v3208_v31 }
  0xa4   : > { %2592 = vmatmul.mubr.msk.f32.gmra.mxu0 %vm601_vm5, %v3211_v34 }
  0xa5   : > { %v408_v57 = vpop.permute.xlu0 %407  ;;  %v410_v32 = vpop.permute.xlu1 %409 }
  0xa6   : > { %v558_v40 = vsel %vm551_vm3, %v325_v35, %v408_v57  ;;  %v559_v42 = vsel %vm551_vm3, %v3014_v36, %v410_v32  ;;  %v326_v36 = vsel %vm261_vm2, 0.0, %v274_v28 }
  0xa9   : > { %v492_v44 = vpop.permute.xlu0 %491  ;;  %v494_v45 = vpop.permute.xlu1 %493 }
  0xaa   : > { %v3224_v49 = vsel %vm576_vm4, %v558_v40, %v492_v44  ;;  %v3227_v51 = vsel %vm576_vm4, %v559_v42, %v494_v45 }
  0xab   : > { %2594 = vmatprep.mubr.msk.f32.mxu0 %vm601_vm5, %v3224_v49 }
  0xac   : > { %2595 = vmatmul.mubr.msk.f32.gmra.mxu0 %vm601_vm5, %v3227_v51 }
  0xad   : > { %v412_v14 = vpop.permute.xlu0 %411  ;;  %v414_v23 = vpop.permute.xlu1 %413 }
  0xae   : > { %v560_v53 = vsel %vm551_vm3, %v326_v36, %v412_v14  ;;  %v561_v54 = vsel %vm551_vm3, %v3019_v37, %v414_v23  ;;  %v327_v37 = vsel %vm261_vm2, 0.0, %v277_v30 }
  0xb1   : > { %v496_v55 = vpop.permute.xlu0 %495  ;;  %v498_v61 = vpop.permute.xlu1 %497 }
  0xb2   : > { %v3240_v63 = vsel %vm576_vm4, %v560_v53, %v496_v55  ;;  %v3243_v0 = vsel %vm576_vm4, %v561_v54, %v498_v61  ;;  %v331_v61 = vsel %vm261_vm2, 0.0, %v289_v25  ;;  %v263_v25 = vrot.slane %v3149_v48, 7 }
  0xb3   : > { %2597 = vmatprep.mubr.msk.f32.mxu0 %vm601_vm5, %v3240_v63 }
  0xb4   : > { %2598 = vmatmul.mubr.msk.f32.gmra.mxu0 %vm601_vm5, %v3243_v0  ;;  %v264_v46 = vsel %vm261_vm2, %v262_v20, %v263_v25  ;;  %v1294_v25 = vld [vmem:[%s4073_s3 + $0x10] sm:$0xff] }
  0xb5   : > { %v416_v21 = vpop.permute.xlu0 %415  ;;  %v418_v28 = vpop.permute.xlu1 %417 }
  0xb6   : > { %v562_v1 = vsel %vm551_vm3, %v327_v37, %v416_v21  ;;  %v563_v4 = vsel %vm551_vm3, %v3024_v38, %v418_v28  ;;  %v328_v38 = vsel %vm261_vm2, 0.0, %v280_v43  ;;  %v230_v28 = vld [vmem:[%s4072_s2] sm:$0xff] }
  0xb9   : > { %v500_v5 = vpop.permute.xlu0 %499  ;;  %v502_v6 = vpop.permute.xlu1 %501 }
  0xba   : > { %v3256_v8 = vsel %vm576_vm4, %v562_v1, %v500_v5  ;;  %v3259_v10 = vsel %vm576_vm4, %v563_v4, %v502_v6 }
  0xbb   : > { %2600 = vmatprep.mubr.msk.f32.mxu0 %vm601_vm5, %v3256_v8 }
  0xbc   : > { %2601 = vmatmul.mubr.msk.f32.gmra.mxu0 %vm601_vm5, %v3259_v10 }
  0xbd   : > { %v420_v26 = vpop.permute.xlu0 %419  ;;  %v422_v30 = vpop.permute.xlu1 %421 }
  0xbe   : > { %v564_v11 = vsel %vm551_vm3, %v328_v38, %v420_v26  ;;  %v565_v16 = vsel %vm551_vm3, %v3042_v47, %v422_v30  ;;  %v329_v47 = vsel %vm261_vm2, 0.0, %v283_v52  ;;  %v322_v26 = vsel %vm261_vm2, 0.0, %v262_v20 }
  0xc1   : > { %v504_v17 = vpop.permute.xlu0 %503  ;;  %v506_v19 = vpop.permute.xlu1 %505 }
  0xc2   : > { %v3272_v3 = vsel %vm576_vm4, %v564_v11, %v504_v17  ;;  %v3275_v24 = vsel %vm576_vm4, %v565_v16, %v506_v19 }
  0xc3   : > { %2603 = vmatprep.mubr.msk.f32.mxu0 %vm601_vm5, %v3272_v3 }
  0xc4   : > { %2604 = vmatmul.mubr.msk.f32.gmra.mxu0 %vm601_vm5, %v3275_v24 }
  0xc5   : > { %v424_v41 = vpop.permute.xlu0 %423  ;;  %v426_v43 = vpop.permute.xlu1 %425 }
  0xc6   : > { %v566_v33 = vsel %vm551_vm3, %v329_v47, %v424_v41  ;;  %v567_v7 = vsel %vm551_vm3, %v3060_v56, %v426_v43  ;;  %v330_v56 = vsel %vm261_vm2, 0.0, %v286_v62  ;;  %v1295_v47 = vld [vmem:[%s4073_s3 + $0x18] sm:$0xf] }
  0xc9   : > { %v508_v29 = vpop.permute.xlu0 %507  ;;  %v510_v18 = vpop.permute.xlu1 %509 }
  0xca   : > { %v3288_v57 = vsel %vm576_vm4, %v566_v33, %v508_v29  ;;  %v3291_v32 = vsel %vm576_vm4, %v567_v7, %v510_v18 }
  0xcb   : > { %2606 = vmatprep.mubr.msk.f32.mxu0 %vm601_vm5, %v3288_v57 }
  0xcc   : > { %2607 = vmatmul.mubr.msk.f32.gmra.mxu0 %vm601_vm5, %v3291_v32 }
  0xcd   : > { %v428_v50 = vpop.permute.xlu0 %427  ;;  %v430_v52 = vpop.permute.xlu1 %429 }
  0xce   : > { %v568_v35 = vsel %vm551_vm3, %v330_v56, %v428_v50  ;;  %v569_v45 = vsel %vm551_vm3, %v3085_v2, %v430_v52 }
  0xd1   : > { %v512_v40 = vpop.permute.xlu0 %511  ;;  %v436_v42 = vpop.permute.xlu1 %435 }
  0xd2   : > { %v3302_v44 = vsel %vm576_vm4, %v568_v35, %v512_v40  ;;  %v572_v36 = vsel %vm551_vm3, %v332_v60, %v436_v42 }
  0xd3   : > { %2609 = vmatprep.mubr.msk.f32.mxu0 %vm601_vm5, %v3302_v44 }
  0xd5   : > { %v514_v14 = vpop.permute.xlu0 %513  ;;  %v438_v23 = vpop.permute.xlu1 %437 }
  0xd6   : > { %v3312_v62 = vsel %vm576_vm4, %v569_v45, %v514_v14  ;;  %v573_v2 = vsel %vm551_vm3, %v3103_v13, %v438_v23 }
  0xd7   : > { %2610 = vmatmul.mubr.msk.f32.gmra.mxu0 %vm601_vm5, %v3312_v62 }
  0xd9   : > { %v520_v53 = vpop.permute.xlu0 %519  ;;  %v432_v54 = vpop.permute.xlu1 %431 }
  0xda   : > { %v3318_v55 = vsel %vm576_vm4, %v572_v36, %v520_v53  ;;  %v570_v13 = vsel %vm551_vm3, %v331_v61, %v432_v54  ;;  %v1262_v53 = vstv %s1261_s29  ;;  %v3471_v54 = vstv %s236_s28  ;;  %s3981_s28 = scalar_lea.vmem %s4074_s4, %s2324_s26 }
  0xdb   : > { %2615 = vmatprep.mubr.msk.f32.mxu1 %vm601_vm5, %v3318_v55  ;;  %vm3473_vm6 = vcmp.eq.s32.totalorder %v1262_v53, 1 }
  0xdd   : > { %v522_v9 = vpop.permute.xlu0 %521  ;;  %v434_v12 = vpop.permute.xlu1 %433 }
  0xde   : > { %v3328_v21 = vsel %vm576_vm4, %v573_v2, %v522_v9  ;;  %v571_v5 = vsel %vm551_vm3, %v3120_v27, %v434_v12 }
  0xdf   : > { %2616 = vmatmul.mubr.msk.f32.vlgmr.msra.gmra.mxu1 %vm601_vm5, %v3328_v21 }
  0xe0   : > { %2619 = vmatpush3.msk.msra.mxu1 %vm662_vm0, %v3136_v39 }
  0xe1   : > { %v516_v37 = vpop.permute.xlu0 %515  ;;  %v396_v1 = vpop.permute.xlu1 %395  ;;  %2620 = vmatprep.subr.mxu1 %v230_v28 }
  0xe2   : > { %v3341_v4 = vsel %vm576_vm4, %v570_v13, %v516_v37  ;;  %2621 = vmatpush3.msra.mxu1 %v230_v28  ;;  %v552_v48 = vsel %vm551_vm3, %v322_v26, %v396_v1 }
  0xe3   : > { %2612 = vmatprep.mubr.msk.f32.mxu0 %vm601_vm5, %v3341_v4  ;;  %2686 = vmatprep.subr.msk.mxu1 %vm662_vm0, %v1295_v47 }
  0xe5   : > { %v518_v39 = vpop.permute.xlu0 %517  ;;  %v398_v6 = vpop.permute.xlu1 %397 }
  0xe6   : > { %v596_v30 = vsel %vm576_vm4, %v571_v5, %v518_v39  ;;  %v553_v38 = vsel %vm551_vm3, %v264_v46, %v398_v6 }
  0xe7   : > { %2613 = vmatmul.mubr.msk.f32.gmra.mxu0 %vm601_vm5, %v596_v30 }
  0xe8   : > { %2656 = vmatprep.mubr.msk.f32.mxu0 %vm601_vm5, %v3208_v31 }
  0xe9   : > { %v482_v11 = vpop.permute.xlu1 %481  ;;  %v480_v16 = vpop.permute.xlu0 %479 }
  0xea   : > { %v578_v27 = vsel %vm576_vm4, %v553_v38, %v482_v11  ;;  %v577_v17 = vsel %vm576_vm4, %v552_v48, %v480_v16 }
  0xeb   : > { %2622 = vmatprep.mubr.msk.f32.mxu1 %vm601_vm5, %v577_v17  ;;  %2657 = vmatmul.mubr.msk.f32.vlgmr.msra.gmra.mxu0 %vm601_vm5, %v3211_v34 }
  0xec   : > { %2623 = vmatmul.mubr.msk.f32.vlgmr.msra.gmra.mxu1 %vm601_vm5, %v578_v27  ;;  %2659 = vmatprep.mubr.msk.f32.mxu0 %vm601_vm5, %v3224_v49 }
  0xed   : > { %2625 = vmatprep.mubr.msk.f32.mxu1 %vm601_vm5, %v3185_v15  ;;  %v295_v15 = vrot.slane %v3163_v58, 7  ;;  %2687 = vmatpush3.msk.msra.mxu1 %vm662_vm0, %v1295_v47 }
  0xee   : > { %2688 = vmatprep.subr.mxu1 %v1294_v25 }
  0xef   : > { %2660 = vmatmul.mubr.msk.f32.gmra.mxu0 %vm601_vm5, %v3227_v51  ;;  %v333_v58 = vsel %vm261_vm2, 0.0, %v295_v15  ;;  %2689 = vmatpush3.msra.mxu1 %v1294_v25 }
  0xf0   : > { %2626 = vmatmul.mubr.msk.f32.gmra.mxu1 %vm601_vm5, %v3195_v22  ;;  %2662 = vmatprep.mubr.msk.f32.mxu0 %vm601_vm5, %v3240_v63  ;;  %v440_v22 = vpop.permute.xlu0 %439 }
  0xf1   : > { %2628 = vmatprep.mubr.msk.f32.mxu1 %vm601_vm5, %v3208_v31  ;;  %v296_v31 = vrot.slane %v3166_v59, 7 }
  0xf3   : > { %2663 = vmatmul.mubr.msk.f32.gmra.mxu0 %vm601_vm5, %v3243_v0 }
  0xf4   : > { %2629 = vmatmul.mubr.msk.f32.gmra.mxu1 %vm601_vm5, %v3211_v34  ;;  %2665 = vmatprep.mubr.msk.f32.mxu0 %vm601_vm5, %v3256_v8  ;;  %v442_v34 = vpop.permute.xlu1 %441  ;;  %v524_v59 = vpop.permute.xlu0 %523 }
  0xf5   : > { %2631 = vmatprep.mubr.msk.f32.mxu1 %vm601_vm5, %v3224_v49  ;;  %v574_v49 = vsel %vm551_vm3, %v333_v58, %v440_v22 }
  0xf7   : > { %2666 = vmatmul.mubr.msk.f32.gmra.mxu0 %vm601_vm5, %v3259_v10 }
  0xf8   : > { %2632 = vmatmul.mubr.msk.f32.gmra.mxu1 %vm601_vm5, %v3227_v51  ;;  %2668 = vmatprep.mubr.msk.f32.mxu0 %vm601_vm5, %v3272_v3  ;;  %v297_v51 = vsel %vm261_vm2, %v295_v15, %v296_v31 }
  0xf9   : > { %2634 = vmatprep.mubr.msk.f32.mxu1 %vm601_vm5, %v3240_v63  ;;  %v575_v63 = vsel %vm551_vm3, %v297_v51, %v442_v34 }
  0xfb   : > { %2669 = vmatmul.mubr.msk.f32.gmra.mxu0 %vm601_vm5, %v3275_v24 }
  0xfc   : > { %2635 = vmatmul.mubr.msk.f32.gmra.mxu1 %vm601_vm5, %v3243_v0  ;;  %2671 = vmatprep.mubr.msk.f32.mxu0 %vm601_vm5, %v3288_v57  ;;  %v599_v0 = vsel %vm576_vm4, %v574_v49, %v524_v59 }
  0xfd   : > { %2637 = vmatprep.mubr.msk.f32.mxu1 %vm601_vm5, %v3256_v8  ;;  %v526_v8 = vpop.permute.xlu1 %525 }
  0xff   : > { %2672 = vmatmul.mubr.msk.f32.gmra.mxu0 %vm601_vm5, %v3291_v32 }
 0x100   : > { %2638 = vmatmul.mubr.msk.f32.gmra.mxu1 %vm601_vm5, %v3259_v10  ;;  %2674 = vmatprep.mubr.msk.f32.mxu0 %vm601_vm5, %v3302_v44  ;;  %v600_v10 = vsel %vm576_vm4, %v575_v63, %v526_v8 }
 0x101   : > { %2640 = vmatprep.mubr.msk.f32.mxu1 %vm601_vm5, %v3272_v3 }
 0x103   : > { %2675 = vmatmul.mubr.msk.f32.gmra.mxu0 %vm601_vm5, %v3312_v62 }
 0x104   : > { %2641 = vmatmul.mubr.msk.f32.gmra.mxu1 %vm601_vm5, %v3275_v24  ;;  %2677 = vmatprep.mubr.msk.f32.mxu0 %vm601_vm5, %v3341_v4 }
 0x105   : > { %2643 = vmatprep.mubr.msk.f32.mxu1 %vm601_vm5, %v3288_v57 }
 0x107   : > { %2678 = vmatmul.mubr.msk.f32.gmra.mxu0 %vm601_vm5, %v596_v30 }
 0x108   : > { %2644 = vmatmul.mubr.msk.f32.gmra.mxu1 %vm601_vm5, %v3291_v32  ;;  %2680 = vmatprep.mubr.msk.f32.mxu0 %vm601_vm5, %v3318_v55 }
 0x109   : > { %2646 = vmatprep.mubr.msk.f32.mxu1 %vm601_vm5, %v3302_v44 }
 0x10b   : > { %2681 = vmatmul.mubr.msk.f32.gmra.mxu0 %vm601_vm5, %v3328_v21 }
 0x10c   : > { %2647 = vmatmul.mubr.msk.f32.gmra.mxu1 %vm601_vm5, %v3312_v62  ;;  %2683 = vmatprep.mubr.msk.f32.mxu0 %vm601_vm5, %v599_v0  ;;  %v1297_v0 = vld [vmem:[%s4073_s3 + $0x28] sm:$0xf] }
 0x10d   : > { %2649 = vmatprep.mubr.msk.f32.mxu1 %vm601_vm5, %v3341_v4  ;;  %2742 = vmatprep.subr.msk.mxu0 %vm662_vm0, %v1297_v0 }
 0x10e   : > { %2743 = vmatpush3.msk.msra.mxu0 %vm662_vm0, %v1297_v0 }
 0x10f   : > { %2684 = vmatmul.mubr.msk.f32.gmra.mxu0 %vm601_vm5, %v600_v10 }
 0x110   : > { %2650 = vmatmul.mubr.msk.f32.gmra.mxu1 %vm601_vm5, %v596_v30 }
 0x15f   : > { %v2590_v19 = vpop.f32.mrf.mxu0 }
 0x161   : > { %v732_v3 = vpop.f32.mrf.mxu0 }
 0x164   : > { %v2593_v24 = vpop.f32.mrf.mxu0 }
 0x166   : > { %v742_v41 = vpop.f32.mrf.mxu0 }
 0x16c   : > { %v2596_v43 = vpop.f32.mrf.mxu0 }
 0x16e   : > { %v752_v33 = vpop.f32.mrf.mxu0 }
 0x174   : > { %v3442_v7 = vpop.f32.mrf.mxu0 }
 0x176   : > { %v3444_v29 = vpop.f32.mrf.mxu0 }
 0x17c   : > { %v3446_v18 = vpop.f32.mrf.mxu0 }
 0x17e   : > { %v3448_v57 = vpop.f32.mrf.mxu0 }
 0x184   : > { %v3450_v32 = vpop.f32.mrf.mxu0 }
 0x186   : > { %v3452_v50 = vpop.f32.mrf.mxu0 }
 0x18c   : > { %v3454_v52 = vpop.f32.mrf.mxu0 }
 0x18e   : > { %v3456_v56 = vpop.f32.mrf.mxu0 }
 0x197   : > { %v3458_v35 = vpop.f32.mrf.mxu0 }
 0x199   : > { %v3460_v40 = vpop.f32.mrf.mxu0 }
 0x19f   : > { %v3463_v42 = vpop.f32.mrf.mxu1 }
 0x1a1   : > { %v3469_v14 = vpop.f32.mrf.mxu1 }
 0x1a7   : > { %v3465_v44 = vpop.f32.mrf.mxu0 }
 0x1a9   : > { %v3467_v45 = vpop.f32.mrf.mxu0 }
 0x1ab   : > { %v2658_v23 = vpop.f32.mrf.mxu0 }
 0x1ac   : > { %v2624_v60 = vpop.f32.mrf.mxu1 }
 0x1ad   : > { %v912_v62 = vadd.f32 %v2624_v60, %v2590_v19  ;;  %v1080_v36 = vpop.f32.mrf.mxu0 }
 0x1ae   : > { %v906_v55 = vpop.f32.mrf.mxu1 }
 0x1af   : > { %v1180_v2 = vadd.f32 %v2658_v23, %v912_v62  ;;  %v907_v9 = vadd.f32 %v906_v55, %v732_v3  ;;  %v2661_v12 = vpop.f32.mrf.mxu0 }
 0x1b0   : > { %v2627_v61 = vpop.f32.mrf.mxu1 }
 0x1b1   : > { %v1221_v28 = vmul.f32 %v3471_v54, %v1180_v2  ;;  %v1179_v13 = vadd.f32 %v1080_v36, %v907_v9  ;;  %v922_v37 = vadd.f32 %v2627_v61, %v2593_v24  ;;  %v1090_v1 = vpop.f32.mrf.mxu0  ;;  %vm1200_vm7 = vcmp.gt.f32.partialorder %v1180_v2, 0.0 }
 0x1b2   : > { %v916_v20 = vpop.f32.mrf.mxu1 }
 0x1b3   : > { %v1220_v4 = vmul.f32 %v3471_v54, %v1179_v13  ;;  %v1182_v5 = vadd.f32 %v2661_v12, %v922_v37  ;;  %v917_v39 = vadd.f32 %v916_v20, %v742_v41  ;;  %v2664_v6 = vpop.f32.mrf.mxu0  ;;  %v1241_v26 = vsel %vm1200_vm7, %v1180_v2, %v1221_v28 }
 0x1b4   : > { %v2630_v30 = vpop.f32.mrf.mxu1  ;;  %v3484_v46 = vsel %vm3473_vm6, 0.0, %v1241_v26  ;;  %vm1199_vm8 = vcmp.gt.f32.partialorder %v1179_v13, 0.0 }
 0x1b5   : > { %v1181_v48 = vadd.f32 %v1090_v1, %v917_v39  ;;  %v932_v38 = vadd.f32 %v2630_v30, %v2596_v43  ;;  %v1100_v11 = vpop.f32.mrf.mxu0  ;;  %1431 = vrot.lane.b32.xlu1 %v3484_v46, %s2873_s10  ;;  %v1240_v16 = vsel %vm1199_vm8, %v1179_v13, %v1220_v4  ;;  %vm1202_vm9 = vcmp.gt.f32.partialorder %v1182_v5, 0.0 }
 0x1b6   : > { %v926_v27 = vpop.f32.mrf.mxu1  ;;  %v3490_v17 = vsel %vm3473_vm6, 0.0, %v1240_v16  ;;  %v1223_v15 = vmul.f32 %v3471_v54, %v1182_v5  ;;  %v1380_v63 = vrot.slane %v3484_v46, 1 }
 0x1b7   : > { %v1184_v22 = vadd.f32 %v2664_v6, %v932_v38  ;;  %v927_v31 = vadd.f32 %v926_v27, %v752_v33  ;;  %v2667_v58 = vpop.f32.mrf.mxu0  ;;  %1429 = vrot.lane.b32.xlu0 %v3490_v17, %s2873_s10  ;;  %v1379_v34 = vrot.slane %v3490_v17, 1  ;;  %vm1201_vm10 = vcmp.gt.f32.partialorder %v1181_v48, 0.0  ;;  %v1296_v33 = vld [vmem:[%s4073_s3 + $0x20] sm:$0xff] }
 0x1b8   : > { %v2633_v49 = vpop.f32.mrf.mxu1  ;;  %v3496_v51 = vsel %vm1202_vm9, %v1182_v5, %v1223_v15  ;;  %v1222_v59 = vmul.f32 %v3471_v54, %v1181_v48  ;;  %2744 = vmatprep.subr.mxu0 %v1296_v33 }
 0x1b9   : > { %v1183_v8 = vadd.f32 %v1100_v11, %v927_v31  ;;  %v942_v10 = vadd.f32 %v2633_v49, %v3442_v7  ;;  %v1110_v19 = vpop.f32.mrf.mxu0  ;;  %1435 = vrot.lane.b32.xlu1 %v3496_v51, %s2873_s10  ;;  %v1383_v3 = vrot.slane %v3496_v51, 1  ;;  %vm1204_vm11 = vcmp.gt.f32.partialorder %v1184_v22, 0.0  ;;  %2745 = vmatpush3.msra.mxu0 %v1296_v33 }
 0x1ba   : > { %v936_v24 = vpop.f32.mrf.mxu1  ;;  %v3508_v41 = vsel %vm1201_vm10, %v1181_v48, %v1222_v59  ;;  %v1225_v43 = vmul.f32 %v3471_v54, %v1184_v22  ;;  %v3514_v47 = vsel %vm334_vm1, %v1379_v34, %v1380_v63  ;;  %v1266_v34 = vstv %s3546_s13 }
 0x1bb   : > { %v937_v7 = vadd.f32 %v936_v24, %v3444_v29  ;;  %v2670_v23 = vpop.f32.mrf.mxu0  ;;  %v1382_v60 = vrot.slane %v3508_v41, 1  ;;  %1433 = vrot.lane.b32.xlu0 %v3508_v41, %s2873_s10  ;;  %v1420_v36 = vsel %vm334_vm1, %v1383_v3, 0.0  ;;  %vm1203_vm12 = vcmp.gt.f32.partialorder %v1183_v8, 0.0 }
 0x1bc   : > { %v2636_v62 = vpop.f32.mrf.mxu1  ;;  %v1224_v53 = vmul.f32 %v3471_v54, %v1183_v8  ;;  %v1186_v55 = vadd.f32 %v2667_v58, %v942_v10  ;;  %v3529_v29 = vsel %vm1204_vm11, %v1184_v22, %v1225_v43  ;;  %v1320_v49 = vrot.slane %v3484_v46, 7 }
 0x1bd   : > { %v952_v2 = vadd.f32 %v2636_v62, %v3446_v18  ;;  %v1120_v9 = vpop.f32.mrf.mxu0  ;;  %1505 = vrot.lane.b32.xlu1 %v1420_v36, %s2874_s11  ;;  %v1185_v12 = vadd.f32 %v1110_v19, %v937_v7  ;;  %v1384_v21 = vsel %vm334_vm1, %v1382_v60, %v1383_v3  ;;  %v1386_v20 = vrot.slane %v3529_v29, 1 }
 0x1be   : > { %v946_v61 = vpop.f32.mrf.mxu1  ;;  %v3535_v37 = vsel %vm1203_vm12, %v1183_v8, %v1224_v53  ;;  %v1227_v39 = vmul.f32 %v3471_v54, %v1186_v55  ;;  %vm1206_vm13 = vcmp.gt.f32.partialorder %v1186_v55, 0.0  ;;  %v1319_v59 = vrot.slane %v3490_v17, 7 }
 0x1bf   : > { %v947_v28 = vadd.f32 %v946_v61, %v3448_v57  ;;  %v2673_v13 = vpop.f32.mrf.mxu0  ;;  %1503 = vrot.lane.b32.xlu0 %v1384_v21, %s2874_s11  ;;  %v1188_v18 = vadd.f32 %v2670_v23, %v952_v2  ;;  %v1385_v6 = vrot.slane %v3535_v37, 1  ;;  %v1226_v26 = vmul.f32 %v3471_v54, %v1185_v12 }
 0x1c0   : > { %v2639_v1 = vpop.f32.mrf.mxu1  ;;  %vm1205_vm14 = vcmp.gt.f32.partialorder %v1185_v12, 0.0  ;;  %v1421_v38 = vsel %vm334_vm1, %v1386_v20, 0.0  ;;  %v3555_v22 = vsel %vm1206_vm13, %v1186_v55, %v1227_v39  ;;  %v1323_v0 = vrot.slane %v3496_v51, 7 }
 0x1c1   : > { %v1187_v25 = vadd.f32 %v1120_v9, %v947_v28  ;;  %v962_v4 = vadd.f32 %v2639_v1, %v3450_v32  ;;  %v1130_v5 = vpop.f32.mrf.mxu0  ;;  %1439 = vrot.lane.b32.xlu1 %v3529_v29, %s2873_s10  ;;  %v1229_v11 = vmul.f32 %v3471_v54, %v1188_v18  ;;  %vm1208_vm15 = vcmp.gt.f32.partialorder %v1188_v18, 0.0 }
 0x1c2   : > { %v956_v57 = vpop.f32.mrf.mxu1  ;;  %v1387_v31 = vsel %vm334_vm1, %v1385_v6, %v1386_v20  ;;  %v3558_v58 = vsel %vm1205_vm14, %v1185_v12, %v1226_v26  ;;  %v1389_v24 = vrot.slane %v3555_v22, 1  ;;  %v1322_v7 = vrot.slane %v3508_v41, 7  ;;  %v1292_v41 = vld [vmem:[%s4073_s3] sm:$0xff] }
 0x1c3   : > { %v957_v30 = vadd.f32 %v956_v57, %v3452_v50  ;;  %v2676_v48 = vpop.f32.mrf.mxu0  ;;  %1437 = vrot.lane.b32.xlu0 %v3535_v37, %s2873_s10  ;;  %v1228_v16 = vmul.f32 %v3471_v54, %v1187_v25  ;;  %v1190_v27 = vadd.f32 %v2673_v13, %v962_v4  ;;  %vm1207_vm6 = vcmp.gt.f32.partialorder %v1187_v25, 0.0 }
 0x1c4   : > { %v2642_v32 = vpop.f32.mrf.mxu1  ;;  %v3567_v43 = vsel %vm1208_vm15, %v1188_v18, %v1229_v11  ;;  %v1326_v23 = vrot.slane %v3529_v29, 7  ;;  %v1388_v62 = vrot.slane %v3558_v58, 1  ;;  %v1329_v55 = vrot.slane %v3555_v22, 7 }
 0x1c5   : > { %v1140_v15 = vpop.f32.mrf.mxu0  ;;  %1509 = vrot.lane.b32.xlu1 %v1421_v38, %s2874_s11  ;;  %v1189_v8 = vadd.f32 %v1130_v5, %v957_v30  ;;  %v3569_v33 = vsel %vm1207_vm6, %v1187_v25, %v1228_v16  ;;  %v1231_v36 = vmul.f32 %v3471_v54, %v1190_v27  ;;  %v972_v53 = vadd.f32 %v2642_v32, %v3454_v52 }
 0x1c6   : > { %v966_v50 = vpop.f32.mrf.mxu1  ;;  %vm1210_vm7 = vcmp.gt.f32.partialorder %v1190_v27, 0.0  ;;  %v1391_v61 = vrot.slane %v3569_v33, 1  ;;  %v1392_v21 = vrot.slane %v3567_v43, 1  ;;  %v1422_v1 = vsel %vm334_vm1, %v1389_v24, 0.0 }
 0x1c7   : > { %v2679_v10 = vpop.f32.mrf.mxu0  ;;  %1507 = vrot.lane.b32.xlu0 %v1387_v31, %s2874_s11  ;;  %v967_v19 = vadd.f32 %v966_v50, %v3456_v56  ;;  %v1325_v56 = vrot.slane %v3535_v37, 7  ;;  %v1230_v28 = vmul.f32 %v3471_v54, %v1189_v8  ;;  %vm1209_vm8 = vcmp.gt.f32.partialorder %v1189_v8, 0.0 }
 0x1c8   : > { %v2645_v3 = vpop.f32.mrf.mxu1  ;;  %v1328_v20 = vrot.slane %v3558_v58, 7  ;;  %v1390_v4 = vsel %vm334_vm1, %v1388_v62, %v1389_v24  ;;  %v3593_v5 = vsel %vm1210_vm7, %v1190_v27, %v1231_v36  ;;  %vm3595_vm9 = vcmp.eq.s32.totalorder %v1266_v34, 1 }
 0x1c9   : > { %v1150_v60 = vpop.f32.mrf.mxu0  ;;  %1443 = vrot.lane.b32.xlu1 %v3555_v22, %s2873_s10  ;;  %v1191_v13 = vadd.f32 %v1140_v15, %v967_v19  ;;  %v982_v18 = vadd.f32 %v2645_v3, %v3458_v35  ;;  %v1192_v35 = vadd.f32 %v2676_v48, %v972_v53  ;;  %v1332_v26 = vrot.slane %v3567_v43, 7 }
 0x1ca   : > { %v976_v2 = vpop.f32.mrf.mxu1  ;;  %v1331_v30 = vrot.slane %v3569_v33, 7  ;;  %v1423_v11 = vsel %vm334_vm1, %v1392_v21, 0.0  ;;  %v1393_v48 = vsel %vm334_vm1, %v1391_v61, %v1392_v21  ;;  %v3611_v16 = vsel %vm1209_vm8, %v1189_v8, %v1230_v28 }
 0x1cb   : > { %v977_v9 = vadd.f32 %v976_v2, %v3460_v40  ;;  %v2682_v12 = vpop.f32.mrf.mxu0  ;;  %1441 = vrot.lane.b32.xlu0 %v3558_v58, %s2873_s10  ;;  %v1194_v27 = vadd.f32 %v2679_v10, %v982_v18  ;;  %v1335_v50 = vrot.slane %v3593_v5, 7  ;;  %v1395_v31 = vrot.slane %v3593_v5, 1 }
 0x1cc   : > { %v2648_v52 = vpop.f32.mrf.mxu1  ;;  %vm1211_vm10 = vcmp.gt.f32.partialorder %v1191_v13, 0.0  ;;  %vm1212_vm11 = vcmp.gt.f32.partialorder %v1192_v35, 0.0  ;;  %v1233_v10 = vmul.f32 %v3471_v54, %v1192_v35  ;;  %v3687_v29 = vsel %vm261_vm2, %v1328_v20, %v1329_v55 }
 0x1cd   : > { %v992_v40 = vadd.f32 %v2648_v52, %v3465_v44  ;;  %v1160_v25 = vpop.f32.mrf.mxu0  ;;  %1513 = vrot.lane.b32.xlu1 %v1422_v1, %s2874_s11  ;;  %v1193_v57 = vadd.f32 %v1150_v60, %v977_v9  ;;  %v3604_v44 = vld [vmem:[%s4073_s3 + $0x8] sm:$0xf]  ;;  %v1334_v60 = vrot.slane %v3611_v16, 7  ;;  %vm1214_vm13 = vcmp.gt.f32.partialorder %v1194_v27, 0.0 }
 0x1ce   : > { %v986_v6 = vpop.f32.mrf.mxu1  ;;  %2714 = vmatprep.subr.msk.mxu1 %vm662_vm0, %v3604_v44  ;;  %v1424_v52 = vsel %vm334_vm1, %v1395_v31, 0.0 }
 0x1cf   : > { %v987_v32 = vadd.f32 %v986_v6, %v3467_v45  ;;  %1511 = vrot.lane.b32.xlu0 %v1390_v4, %s2874_s11  ;;  %v2685_v38 = vpop.f32.mrf.mxu0  ;;  %v1232_v45 = vmul.f32 %v3471_v54, %v1191_v13  ;;  %v1196_v34 = vadd.f32 %v2682_v12, %v992_v40  ;;  %v1234_v62 = vmul.f32 %v3471_v54, %v1193_v57 }
 0x1d0   : > { %v2651_v15 = vpop.f32.mrf.mxu1  ;;  %vm1213_vm12 = vcmp.gt.f32.partialorder %v1193_v57, 0.0  ;;  %v3703_v22 = vsel %vm261_vm2, %v1334_v60, %v1335_v50 }
 0x1d1   : > { %v1195_v19 = vadd.f32 %v1160_v25, %v987_v32  ;;  %v1002_v3 = vadd.f32 %v2651_v15, %v3463_v42  ;;  %1447 = vrot.lane.b32.xlu1 %v3567_v43, %s2873_s10  ;;  %v1170_v24 = vpop.f32.mrf.mxu0  ;;  %v1394_v42 = vrot.slane %v3611_v16, 1  ;;  %v3628_v2 = vsel %vm1211_vm10, %v1191_v13, %v1232_v45 }
 0x1d2   : > { %v996_v8 = vpop.f32.mrf.mxu1  ;;  %v1237_v21 = vmul.f32 %v3471_v54, %v1196_v34  ;;  %v3635_v28 = vsel %vm1213_vm12, %v1193_v57, %v1234_v62  ;;  %vm1216_vm15 = vcmp.gt.f32.partialorder %v1196_v34, 0.0  ;;  %v3642_v13 = vsel %vm261_vm2, %v1319_v59, %v1320_v49 }
 0x1d3   : > { %v997_v36 = vadd.f32 %v996_v8, %v3469_v14  ;;  %v1198_v53 = vadd.f32 %v2685_v38, %v1002_v3  ;;  %1445 = vrot.lane.b32.xlu0 %v3569_v33, %s2873_s10  ;;  %vm1215_vm14 = vcmp.gt.f32.partialorder %v1195_v19, 0.0  ;;  %v1236_v9 = vmul.f32 %v3471_v54, %v1195_v19 }
 0x1d4   : > { %v1235_v14 = vmul.f32 %v3471_v54, %v1194_v27  ;;  %v1253_v25 = vsel %vm1212_vm11, %v1192_v35, %v1233_v10  ;;  %v1337_v4 = vrot.slane %v3628_v2, 7  ;;  %v1340_v49 = vrot.slane %v3635_v28, 7 }
 0x1d5   : > { %v1239_v12 = vmul.f32 %v3471_v54, %v1198_v53  ;;  %v1197_v61 = vadd.f32 %v1170_v24, %v997_v36  ;;  %1517 = vrot.lane.b32.xlu1 %v1423_v11, %s2874_s11  ;;  %vm1218_vm6 = vcmp.gt.f32.partialorder %v1198_v53, 0.0  ;;  %v3649_v1 = vsel %vm1215_vm14, %v1195_v19, %v1236_v9 }
 0x1d6   : > { %v1257_v6 = vsel %vm1216_vm15, %v1196_v34, %v1237_v21  ;;  %v1343_v38 = vrot.slane %v3649_v1, 7  ;;  %v3669_v11 = vsel %vm261_vm2, %v1322_v7, %v1323_v0  ;;  %v1338_v39 = vrot.slane %v1253_v25, 7 }
 0x1d7   : > { %v1238_v18 = vmul.f32 %v3471_v54, %v1197_v61  ;;  %1515 = vrot.lane.b32.xlu0 %v1393_v48, %s2874_s11  ;;  %v1259_v40 = vsel %vm1218_vm6, %v1198_v53, %v1239_v12  ;;  %vm1217_vm7 = vcmp.gt.f32.partialorder %v1197_v61, 0.0  ;;  %v1255_v54 = vsel %vm1214_vm13, %v1194_v27, %v1235_v14 }
 0x1d8   : > { %v1291_v57 = vsel %vm3595_vm9, 0.0, %v1259_v40  ;;  %v3676_v48 = vsel %vm261_vm2, %v1325_v56, %v1326_v23  ;;  %v1341_v45 = vrot.slane %v1255_v54, 7  ;;  %v1344_v34 = vrot.slane %v1257_v6, 7 }
 0x1d9   : > { %1451 = vrot.lane.b32.xlu1 %v3593_v5, %s2873_s10  ;;  %v1258_v32 = vsel %vm1217_vm7, %v1197_v61, %v1238_v18  ;;  %v1407_v15 = vrot.slane %v1291_v57, 1  ;;  %v3694_v0 = vsel %vm261_vm2, %v1331_v30, %v1332_v26  ;;  %v1347_v23 = vrot.slane %v1291_v57, 7 }
 0x1da   : > { %v3662_v35 = vsel %vm3595_vm9, 0.0, %v1258_v32  ;;  %v3708_v43 = vsel %vm261_vm2, %v1337_v4, %v1338_v39  ;;  %v1396_v55 = vsel %vm334_vm1, %v1394_v42, %v1395_v31  ;;  %v3716_v26 = vsel %vm261_vm2, %v1340_v49, %v1341_v45 }
 0x1db   : > { %1449 = vrot.lane.b32.xlu0 %v3611_v16, %s2873_s10  ;;  %v1346_v27 = vrot.slane %v3662_v35, 7  ;;  %v1406_v51 = vrot.slane %v3662_v35, 1  ;;  %v3721_v3 = vsel %vm261_vm2, %v1343_v38, %v1344_v34  ;;  %v1398_v5 = vrot.slane %v1253_v25, 1 }
 0x1dc   : > { %v1397_v31 = vrot.slane %v3628_v2, 1  ;;  %v1401_v10 = vrot.slane %v1255_v54, 1  ;;  %v1400_v62 = vrot.slane %v3635_v28, 1  ;;  %v1404_v42 = vrot.slane %v1257_v6, 1 }
 0x1dd   : > { %1521 = vrot.lane.b32.xlu1 %v1424_v52, %s2874_s11  ;;  %v1408_v19 = vsel %vm334_vm1, %v1406_v51, %v1407_v15  ;;  %v3727_v50 = vsel %vm261_vm2, %v1346_v27, %v1347_v23  ;;  %v1425_v8 = vsel %vm334_vm1, %v1398_v5, 0.0  ;;  %v1403_v9 = vrot.slane %v3649_v1, 1 }
 0x1de   : > { %v1399_v24 = vsel %vm334_vm1, %v1397_v31, %v1398_v5  ;;  %v1426_v36 = vsel %vm334_vm1, %v1401_v10, 0.0  ;;  %v1402_v53 = vsel %vm334_vm1, %v1400_v62, %v1401_v10  ;;  %v1427_v12 = vsel %vm334_vm1, %v1404_v42, 0.0 }
 0x1df   : > { %1519 = vrot.lane.b32.xlu0 %v1396_v55, %s2874_s11  ;;  %v1405_v61 = vsel %vm334_vm1, %v1403_v9, %v1404_v42  ;;  %v1419_v14 = vsel %vm334_vm1, %v1380_v63, 0.0  ;;  %v1428_v21 = vsel %vm334_vm1, %v1407_v15, 0.0  ;;  %v1371_v51 = vsel %vm261_vm2, 0.0, %v1325_v56 }
 0x1e1   : > { %1455 = vrot.lane.b32.xlu1 %v1253_v25, %s2873_s10 }
 0x1e3   : > { %1453 = vrot.lane.b32.xlu0 %v3628_v2, %s2873_s10 }
 0x1e5   : > { %1525 = vrot.lane.b32.xlu1 %v1425_v8, %s2874_s11 }
 0x1e7   : > { %1523 = vrot.lane.b32.xlu0 %v1399_v24, %s2874_s11 }
 0x1e9   : > { %1459 = vrot.lane.b32.xlu1 %v1255_v54, %s2873_s10  ;;  %v1370_v54 = vsel %vm261_vm2, 0.0, %v1322_v7 }
 0x1eb   : > { %1457 = vrot.lane.b32.xlu0 %v3635_v28, %s2873_s10 }
 0x1ed   : > { %1529 = vrot.lane.b32.xlu1 %v1426_v36, %s2874_s11 }
 0x1ef   : > { %1527 = vrot.lane.b32.xlu0 %v1402_v53, %s2874_s11 }
 0x1f1   : > { %1463 = vrot.lane.b32.xlu1 %v1257_v6, %s2873_s10 }
 0x1f3   : > { %1461 = vrot.lane.b32.xlu0 %v3649_v1, %s2873_s10 }
 0x1f5   : > { %1533 = vrot.lane.b32.xlu1 %v1427_v12, %s2874_s11 }
 0x1f7   : > { %1531 = vrot.lane.b32.xlu0 %v1405_v61, %s2874_s11 }
 0x1f9   : > { %1501 = vrot.lane.b32.xlu1 %v1419_v14, %s2874_s11 }
 0x1fb   : > { %1499 = vrot.lane.b32.xlu0 %v3514_v47, %s2874_s11  ;;  %v1369_v47 = vsel %vm261_vm2, 0.0, %v1319_v59 }
 0x1fd   : > { %1467 = vrot.lane.b32.xlu1 %v1291_v57, %s2873_s10 }
 0x1ff   : > { %1465 = vrot.lane.b32.xlu0 %v3662_v35, %s2873_s10 }
 0x201   : > { %1537 = vrot.lane.b32.xlu1 %v1428_v21, %s2874_s11 }
 0x203   : > { %1535 = vrot.lane.b32.xlu0 %v1408_v19, %s2874_s11 }
 0x227   : > { %v1432_v18 = vpop.permute.xlu1 %1431 }
 0x228   : > { %v3767_v46 = vsel %vm551_vm3, %v3642_v13, %v1432_v18 }
 0x229   : > { %v1430_v63 = vpop.permute.xlu0 %1429 }
 0x22a   : > { %v3773_v52 = vsel %vm551_vm3, %v1369_v47, %v1430_v63 }
 0x22b   : > { %v1436_v40 = vpop.permute.xlu1 %1435 }
 0x22c   : > { %v1562_v13 = vsel %vm551_vm3, %v3669_v11, %v1436_v40 }
 0x22d   : > { %v1434_v25 = vpop.permute.xlu0 %1433 }
 0x22e   : > { %v1561_v6 = vsel %vm551_vm3, %v1370_v54, %v1434_v25 }
 0x22f   : > { %v1506_v57 = vpop.permute.xlu1 %1505 }
 0x230   : > { %v3785_v59 = vsel %vm576_vm4, %v1562_v13, %v1506_v57  ;;  %v1376_v13 = vsel %vm261_vm2, 0.0, %v1340_v49 }
 0x231   : > { %v1504_v32 = vpop.permute.xlu0 %1503 }
 0x232   : > { %v3782_v17 = vsel %vm576_vm4, %v1561_v6, %v1504_v32 }
 0x233   : > { %v1440_v39 = vpop.permute.xlu1 %1439  ;;  %2690 = vmatprep.mubr.msk.f32.mxu1 %vm601_vm5, %v3782_v17 }
 0x234   : > { %2691 = vmatmul.mubr.msk.f32.vlgmr.msra.gmra.mxu1 %vm601_vm5, %v3785_v59  ;;  %v1564_v34 = vsel %vm551_vm3, %v3676_v48, %v1440_v39  ;;  %v1372_v48 = vsel %vm261_vm2, 0.0, %v1328_v20 }
 0x235   : > { %v1438_v7 = vpop.permute.xlu0 %1437  ;;  %2715 = vmatpush3.msk.msra.mxu1 %vm662_vm0, %v3604_v44 }
 0x236   : > { %2716 = vmatprep.subr.mxu1 %v1292_v41  ;;  %v1563_v15 = vsel %vm551_vm3, %v1371_v51, %v1438_v7 }
 0x237   : > { %v1510_v11 = vpop.permute.xlu1 %1509  ;;  %2717 = vmatpush3.msra.mxu1 %v1292_v41 }
 0x238   : > { %v3806_v19 = vsel %vm576_vm4, %v1564_v34, %v1510_v11 }
 0x239   : > { %v1508_v45 = vpop.permute.xlu0 %1507 }
 0x23a   : > { %v3803_v23 = vsel %vm576_vm4, %v1563_v15, %v1508_v45  ;;  %v1377_v15 = vsel %vm261_vm2, 0.0, %v1343_v38 }
 0x23b   : > { %v1444_v44 = vpop.permute.xlu1 %1443  ;;  %2693 = vmatprep.mubr.msk.f32.mxu1 %vm601_vm5, %v3803_v23  ;;  %2746 = vmatprep.mubr.msk.f32.mxu0 %vm601_vm5, %v3803_v23 }
 0x23c   : > { %2694 = vmatmul.mubr.msk.f32.gmra.mxu1 %vm601_vm5, %v3806_v19  ;;  %2747 = vmatmul.mubr.msk.f32.vlgmr.msra.gmra.mxu0 %vm601_vm5, %v3806_v19  ;;  %v1566_v31 = vsel %vm551_vm3, %v3687_v29, %v1444_v44  ;;  %v1373_v29 = vsel %vm261_vm2, 0.0, %v1331_v30 }
 0x23d   : > { %v1442_v37 = vpop.permute.xlu0 %1441 }
 0x23e   : > { %v1565_v55 = vsel %vm551_vm3, %v1372_v48, %v1442_v37 }
 0x23f   : > { %v1514_v56 = vpop.permute.xlu1 %1513 }
 0x240   : > { %v3826_v24 = vsel %vm576_vm4, %v1566_v31, %v1514_v56 }
 0x241   : > { %v1512_v5 = vpop.permute.xlu0 %1511 }
 0x242   : > { %v3823_v8 = vsel %vm576_vm4, %v1565_v55, %v1512_v5  ;;  %v1378_v5 = vsel %vm261_vm2, 0.0, %v1346_v27 }
 0x243   : > { %v1448_v10 = vpop.permute.xlu1 %1447  ;;  %2696 = vmatprep.mubr.msk.f32.mxu1 %vm601_vm5, %v3823_v8  ;;  %2749 = vmatprep.mubr.msk.f32.mxu0 %vm601_vm5, %v3823_v8 }
 0x244   : > { %2697 = vmatmul.mubr.msk.f32.gmra.mxu1 %vm601_vm5, %v3826_v24  ;;  %2750 = vmatmul.mubr.msk.f32.gmra.mxu0 %vm601_vm5, %v3826_v24  ;;  %v1568_v53 = vsel %vm551_vm3, %v3694_v0, %v1448_v10  ;;  %v1374_v0 = vsel %vm261_vm2, 0.0, %v1334_v60 }
 0x245   : > { %v1446_v58 = vpop.permute.xlu0 %1445 }
 0x246   : > { %v1567_v62 = vsel %vm551_vm3, %v1373_v29, %v1446_v58 }
 0x247   : > { %v1518_v20 = vpop.permute.xlu1 %1517 }
 0x248   : > { %v3846_v9 = vsel %vm576_vm4, %v1568_v53, %v1518_v20 }
 0x249   : > { %v1516_v36 = vpop.permute.xlu0 %1515 }
 0x24a   : > { %v3843_v42 = vsel %vm576_vm4, %v1567_v62, %v1516_v36 }
 0x24b   : > { %v1452_v12 = vpop.permute.xlu1 %1451  ;;  %2699 = vmatprep.mubr.msk.f32.mxu1 %vm601_vm5, %v3843_v42  ;;  %2752 = vmatprep.mubr.msk.f32.mxu0 %vm601_vm5, %v3843_v42 }
 0x24c   : > { %2700 = vmatmul.mubr.msk.f32.gmra.mxu1 %vm601_vm5, %v3846_v9  ;;  %2753 = vmatmul.mubr.msk.f32.gmra.mxu0 %vm601_vm5, %v3846_v9  ;;  %v1570_v21 = vsel %vm551_vm3, %v3703_v22, %v1452_v12  ;;  %v1375_v22 = vsel %vm261_vm2, 0.0, %v1337_v4 }
 0x24d   : > { %v1450_v33 = vpop.permute.xlu0 %1449 }
 0x24e   : > { %v1569_v61 = vsel %vm551_vm3, %v1374_v0, %v1450_v33 }
 0x24f   : > { %v1522_v30 = vpop.permute.xlu1 %1521 }
 0x250   : > { %v3866_v63 = vsel %vm576_vm4, %v1570_v21, %v1522_v30 }
 0x251   : > { %v1520_v14 = vpop.permute.xlu0 %1519 }
 0x252   : > { %v3863_v18 = vsel %vm576_vm4, %v1569_v61, %v1520_v14 }
 0x253   : > { %v1456_v47 = vpop.permute.xlu1 %1455  ;;  %2702 = vmatprep.mubr.msk.f32.mxu1 %vm601_vm5, %v3863_v18  ;;  %2755 = vmatprep.mubr.msk.f32.mxu0 %vm601_vm5, %v3863_v18 }
 0x254   : > { %2703 = vmatmul.mubr.msk.f32.gmra.mxu1 %vm601_vm5, %v3866_v63  ;;  %2756 = vmatmul.mubr.msk.f32.gmra.mxu0 %vm601_vm5, %v3866_v63  ;;  %v1572_v57 = vsel %vm551_vm3, %v3708_v43, %v1456_v47 }
 0x255   : > { %v1454_v16 = vpop.permute.xlu0 %1453 }
 0x256   : > { %v1571_v40 = vsel %vm551_vm3, %v1375_v22, %v1454_v16 }
 0x257   : > { %v1526_v60 = vpop.permute.xlu1 %1525 }
 0x258   : > { %v1592_v6 = vsel %vm576_vm4, %v1572_v57, %v1526_v60 }
 0x259   : > { %v1524_v25 = vpop.permute.xlu0 %1523 }
 0x25a   : > { %v1591_v54 = vsel %vm576_vm4, %v1571_v40, %v1524_v25 }
 0x25b   : > { %v1460_v32 = vpop.permute.xlu1 %1459  ;;  %2705 = vmatprep.mubr.msk.f32.mxu1 %vm601_vm5, %v1591_v54  ;;  %2758 = vmatprep.mubr.msk.f32.mxu0 %vm601_vm5, %v1591_v54 }
 0x25c   : > { %2706 = vmatmul.mubr.msk.f32.gmra.mxu1 %vm601_vm5, %v1592_v6  ;;  %2759 = vmatmul.mubr.msk.f32.gmra.mxu0 %vm601_vm5, %v1592_v6  ;;  %v1574_v41 = vsel %vm551_vm3, %v3716_v26, %v1460_v32 }
 0x25d   : > { %v1458_v2 = vpop.permute.xlu0 %1457 }
 0x25e   : > { %v1573_v43 = vsel %vm551_vm3, %v1376_v13, %v1458_v2 }
 0x25f   : > { %v1530_v4 = vpop.permute.xlu1 %1529 }
 0x260   : > { %v1594_v11 = vsel %vm576_vm4, %v1574_v41, %v1530_v4 }
 0x261   : > { %v1528_v39 = vpop.permute.xlu0 %1527 }
 0x262   : > { %v1593_v7 = vsel %vm576_vm4, %v1573_v43, %v1528_v39  ;;  %v2444_v43 = vld [vmem:[%s2952_s9 + $0x20] sm:$0xff] }
 0x263   : > { %v1464_v51 = vpop.permute.xlu1 %1463  ;;  %2708 = vmatprep.mubr.msk.f32.mxu1 %vm601_vm5, %v1593_v7  ;;  %2761 = vmatprep.mubr.msk.f32.mxu0 %vm601_vm5, %v1593_v7 }
 0x264   : > { %2709 = vmatmul.mubr.msk.f32.gmra.mxu1 %vm601_vm5, %v1594_v11  ;;  %2762 = vmatmul.mubr.msk.f32.gmra.mxu0 %vm601_vm5, %v1594_v11  ;;  %v1576_v34 = vsel %vm551_vm3, %v3721_v3, %v1464_v51 }
 0x265   : > { %v1462_v28 = vpop.permute.xlu0 %1461 }
 0x266   : > { %v1575_v26 = vsel %vm551_vm3, %v1377_v15, %v1462_v28  ;;  %v2447_v15 = vld [vmem:[%s2952_s9 + $0x38] sm:$0xff] }
 0x267   : > { %v1534_v49 = vpop.permute.xlu1 %1533 }
 0x268   : > { %v1596_v37 = vsel %vm576_vm4, %v1576_v34, %v1534_v49 }
 0x269   : > { %v1532_v45 = vpop.permute.xlu0 %1531 }
 0x26a   : > { %v1595_v44 = vsel %vm576_vm4, %v1575_v26, %v1532_v45 }
 0x26b   : > { %v1502_v56 = vpop.permute.xlu1 %1501  ;;  %2711 = vmatprep.mubr.msk.f32.mxu1 %vm601_vm5, %v1595_v44  ;;  %2764 = vmatprep.mubr.msk.f32.mxu0 %vm601_vm5, %v1595_v44 }
 0x26c   : > { %2712 = vmatmul.mubr.msk.f32.gmra.mxu1 %vm601_vm5, %v1596_v37  ;;  %2765 = vmatmul.mubr.msk.f32.gmra.mxu0 %vm601_vm5, %v1596_v37  ;;  %v1580_v3 = vsel %vm576_vm4, %v3767_v46, %v1502_v56 }
 0x26d   : > { %v1500_v1 = vpop.permute.xlu0 %1499 }
 0x26e   : > { %v1579_v38 = vsel %vm576_vm4, %v3773_v52, %v1500_v1 }
 0x26f   : > { %v1468_v48 = vpop.permute.xlu1 %1467  ;;  %2718 = vmatprep.mubr.msk.f32.mxu1 %vm601_vm5, %v1579_v38 }
 0x270   : > { %2719 = vmatmul.mubr.msk.f32.vlgmr.msra.gmra.mxu1 %vm601_vm5, %v1580_v3  ;;  %v1578_v10 = vsel %vm551_vm3, %v3727_v50, %v1468_v48 }
 0x271   : > { %v1466_v55 = vpop.permute.xlu0 %1465  ;;  %2721 = vmatprep.mubr.msk.f32.mxu1 %vm601_vm5, %v3782_v17 }
 0x272   : > { %v1577_v52 = vsel %vm551_vm3, %v1378_v5, %v1466_v55  ;;  %v2446_v55 = vld [vmem:[%s2952_s9 + $0x30] sm:$0xff] }
 0x273   : > { %v1538_v31 = vpop.permute.xlu1 %1537 }
 0x274   : > { %2722 = vmatmul.mubr.msk.f32.gmra.mxu1 %vm601_vm5, %v3785_v59  ;;  %v1598_v17 = vsel %vm576_vm4, %v1578_v10, %v1538_v31 }
 0x275   : > { %v1536_v46 = vpop.permute.xlu0 %1535  ;;  %2724 = vmatprep.mubr.msk.f32.mxu1 %vm601_vm5, %v3803_v23 }
 0x276   : > { %v1597_v58 = vsel %vm576_vm4, %v1577_v52, %v1536_v46  ;;  %v2449_v52 = vld [vmem:[%s2952_s9 + $0x48] sm:$0xff] }
 0x277   : > { %2767 = vmatprep.mubr.msk.f32.mxu0 %vm601_vm5, %v1597_v58 }
 0x278   : > { %2725 = vmatmul.mubr.msk.f32.gmra.mxu1 %vm601_vm5, %v3806_v19  ;;  %2768 = vmatmul.mubr.msk.f32.gmra.mxu0 %vm601_vm5, %v1598_v17 }
 0x279   : > { %2727 = vmatprep.mubr.msk.f32.mxu1 %vm601_vm5, %v3823_v8 }
 0x27c   : > { %2728 = vmatmul.mubr.msk.f32.gmra.mxu1 %vm601_vm5, %v3826_v24 }
 0x27d   : > { %2730 = vmatprep.mubr.msk.f32.mxu1 %vm601_vm5, %v3843_v42 }
 0x280   : > { %2731 = vmatmul.mubr.msk.f32.gmra.mxu1 %vm601_vm5, %v3846_v9 }
 0x281   : > { %2733 = vmatprep.mubr.msk.f32.mxu1 %vm601_vm5, %v3863_v18 }
 0x284   : > { %2734 = vmatmul.mubr.msk.f32.gmra.mxu1 %vm601_vm5, %v3866_v63  ;;  %v3974_v63 = vstv %s2390_s17 }
 0x285   : > { %2736 = vmatprep.mubr.msk.f32.mxu1 %vm601_vm5, %v1591_v54  ;;  %v2445_v54 = vld [vmem:[%s2952_s9 + $0x28] sm:$0xff] }
 0x288   : > { %2737 = vmatmul.mubr.msk.f32.gmra.mxu1 %vm601_vm5, %v1592_v6 }
 0x289   : > { %2739 = vmatprep.mubr.msk.f32.mxu1 %vm601_vm5, %v1593_v7 }
 0x28c   : > { %2740 = vmatmul.mubr.msk.f32.gmra.mxu1 %vm601_vm5, %v1594_v11 }
 0x2f4   : > { %v2692_v35 = vpop.f32.mrf.mxu1 }
 0x2f6   : > { %v1716_v27 = vpop.f32.mrf.mxu1 }
 0x2fc   : > { %v2695_v50 = vpop.f32.mrf.mxu1  ;;  %v2748_v36 = vpop.f32.mrf.mxu0 }
 0x2fe   : > { %v1726_v59 = vpop.f32.mrf.mxu1  ;;  %v2024_v9 = vpop.f32.mrf.mxu0 }
 0x304   : > { %v2698_v23 = vpop.f32.mrf.mxu1  ;;  %v2751_v12 = vpop.f32.mrf.mxu0 }
 0x306   : > { %v1736_v19 = vpop.f32.mrf.mxu1  ;;  %v2034_v0 = vpop.f32.mrf.mxu0 }
 0x30c   : > { %v3952_v8 = vpop.f32.mrf.mxu1  ;;  %v2754_v14 = vpop.f32.mrf.mxu0 }
 0x30e   : > { %v3954_v24 = vpop.f32.mrf.mxu1  ;;  %v2044_v16 = vpop.f32.mrf.mxu0 }
 0x314   : > { %v3956_v20 = vpop.f32.mrf.mxu1  ;;  %v2757_v25 = vpop.f32.mrf.mxu0 }
 0x316   : > { %v3958_v29 = vpop.f32.mrf.mxu1  ;;  %v2054_v51 = vpop.f32.mrf.mxu0 }
 0x31c   : > { %v3960_v62 = vpop.f32.mrf.mxu1  ;;  %v2760_v37 = vpop.f32.mrf.mxu0 }
 0x31e   : > { %v3963_v53 = vpop.f32.mrf.mxu1 }
 0x324   : > { %v3965_v42 = vpop.f32.mrf.mxu1 }
 0x326   : > { %v3967_v33 = vpop.f32.mrf.mxu1 }
 0x32c   : > { %v3969_v30 = vpop.f32.mrf.mxu1 }
 0x32e   : > { %v3971_v61 = vpop.f32.mrf.mxu1 }
 0x330   : > { %v2720_v21 = vpop.f32.mrf.mxu1 }
 0x331   : > { %v1876_v18 = vadd.f32 %v2720_v21, %v2692_v35  ;;  %v2064_v35 = vpop.f32.mrf.mxu0 }
 0x332   : > { %v1870_v47 = vpop.f32.mrf.mxu1 }
 0x333   : > { %v2104_v60 = vadd.f32 %v2748_v36, %v1876_v18  ;;  %v1871_v22 = vadd.f32 %v1870_v47, %v1716_v27  ;;  %v2451_v47 = vld [vmem:[%s2952_s9 + $0x58] sm:$0xff] }
 0x334   : > { %v2723_v40 = vpop.f32.mrf.mxu1 }
 0x335   : > { %vm2120_vm0 = vcmp.gt.f32.partialorder %v2104_v60, 0.0  ;;  %v2137_v57 = vmul.f32 %v3974_v63, %v2104_v60  ;;  %v2103_v6 = vadd.f32 %v2024_v9, %v1871_v22  ;;  %v1886_v32 = vadd.f32 %v2723_v40, %v2695_v50 }
 0x336   : > { %v1880_v2 = vpop.f32.mrf.mxu1 }
 0x337   : > { %v2153_v4 = vsel %vm2120_vm0, %v2104_v60, %v2137_v57  ;;  %vm2119_vm1 = vcmp.gt.f32.partialorder %v2103_v6, 0.0  ;;  %v2136_v13 = vmul.f32 %v3974_v63, %v2103_v6  ;;  %v2106_v39 = vadd.f32 %v2751_v12, %v1886_v32 }
 0x338   : > { %v2188_v41 = vadd.f32 %v2445_v54, %v2153_v4  ;;  %v1881_v7 = vadd.f32 %v1880_v2, %v1726_v59  ;;  %v2726_v11 = vpop.f32.mrf.mxu1  ;;  %v2453_v2 = vld [vmem:[%s2952_s9 + $0x68] sm:$0xff] }
 0x339   : > { %v2152_v28 = vsel %vm2119_vm1, %v2103_v6, %v2136_v13  ;;  %vm2122_vm2 = vcmp.gt.f32.partialorder %v2106_v39, 0.0  ;;  %v2139_v49 = vmul.f32 %v3974_v63, %v2106_v39  ;;  %v1896_v26 = vadd.f32 %v2726_v11, %v2698_v23  ;;  %v2448_v23 = vld [vmem:[%s2952_s9 + $0x40] sm:$0xff] }
 0x33a   : > { %2204 = vst.msk [vmem:[%s3981_s28 + $0x8] sm:$0xff] %vm551_vm3, %v2188_v41  ;;  %v2187_v45 = vadd.f32 %v2444_v43, %v2152_v28  ;;  %v2105_v34 = vadd.f32 %v2034_v0, %v1881_v7  ;;  %v1890_v44 = vpop.f32.mrf.mxu1 }
 0x33b   : > { %v2155_v56 = vsel %vm2122_vm2, %v2106_v39, %v2139_v49  ;;  %v2108_v1 = vadd.f32 %v2754_v14, %v1896_v26  ;;  %v1891_v38 = vadd.f32 %v1890_v44, %v1736_v19 }
 0x33c   : > { %2203 = vst.msk [vmem:[%s3981_s28] sm:$0xff] %vm551_vm3, %v2187_v45  ;;  %v2190_v3 = vadd.f32 %v2447_v15, %v2155_v56  ;;  %vm2121_vm4 = vcmp.gt.f32.partialorder %v2105_v34, 0.0  ;;  %v2138_v48 = vmul.f32 %v3974_v63, %v2105_v34  ;;  %v2729_v5 = vpop.f32.mrf.mxu1 }
 0x33d   : > { %vm2124_vm5 = vcmp.gt.f32.partialorder %v2108_v1, 0.0  ;;  %v2141_v31 = vmul.f32 %v3974_v63, %v2108_v1  ;;  %v2107_v46 = vadd.f32 %v2044_v16, %v1891_v38  ;;  %v1906_v10 = vadd.f32 %v2729_v5, %v3952_v8  ;;  %v2763_v8 = vpop.f32.mrf.mxu0 }
 0x33e   : > { %2206 = vst.msk [vmem:[%s3981_s28 + $0x18] sm:$0xff] %vm551_vm3, %v2190_v3  ;;  %v2154_v58 = vsel %vm2121_vm4, %v2105_v34, %v2138_v48  ;;  %v1900_v17 = vpop.f32.mrf.mxu1 }
 0x33f   : > { %v2189_v27 = vadd.f32 %v2446_v55, %v2154_v58  ;;  %v2157_v50 = vsel %vm2124_vm5, %v2108_v1, %v2141_v31  ;;  %vm2123_vm8 = vcmp.gt.f32.partialorder %v2107_v46, 0.0  ;;  %v2140_v59 = vmul.f32 %v3974_v63, %v2107_v46  ;;  %v2074_v54 = vpop.f32.mrf.mxu0  ;;  %v2454_v55 = vld [vmem:[%s2952_s9 + $0x70] sm:$0xff] }
 0x340   : > { %v2192_v19 = vadd.f32 %v2449_v52, %v2157_v50  ;;  %v2110_v36 = vadd.f32 %v2757_v25, %v1906_v10  ;;  %v1901_v9 = vadd.f32 %v1900_v17, %v3954_v24  ;;  %v2732_v12 = vpop.f32.mrf.mxu1  ;;  %v2450_v25 = vld [vmem:[%s2952_s9 + $0x50] sm:$0xff]  ;;  %v2457_v10 = vld [vmem:[%s2952_s9 + $0x88] sm:$0xff] }
 0x341   : > { %2205 = vst.msk [vmem:[%s3981_s28 + $0x10] sm:$0xff] %vm551_vm3, %v2189_v27  ;;  %v2156_v0 = vsel %vm2123_vm8, %v2107_v46, %v2140_v59  ;;  %v1916_v14 = vadd.f32 %v2732_v12, %v3956_v20  ;;  %v2766_v39 = vpop.f32.mrf.mxu0 }
 0x342   : > { %2208 = vst.msk [vmem:[%s3981_s28 + $0x28] sm:$0xff] %vm551_vm3, %v2192_v19  ;;  %v2191_v21 = vadd.f32 %v2448_v23, %v2156_v0  ;;  %vm2126_vm9 = vcmp.gt.f32.partialorder %v2110_v36, 0.0  ;;  %v2143_v18 = vmul.f32 %v3974_v63, %v2110_v36  ;;  %v2109_v16 = vadd.f32 %v2054_v51, %v1901_v9  ;;  %v1910_v60 = vpop.f32.mrf.mxu1  ;;  %v2452_v51 = vld [vmem:[%s2952_s9 + $0x60] sm:$0xff] }
 0x343   : > { %v2112_v22 = vadd.f32 %v2760_v37, %v1916_v14  ;;  %v1911_v24 = vadd.f32 %v1910_v60, %v3958_v29  ;;  %v2455_v37 = vld [vmem:[%s2952_s9 + $0x78] sm:$0xff]  ;;  %v2084_v38 = vpop.f32.mrf.mxu0  ;;  %v2456_v23 = vld [vmem:[%s2952_s9 + $0x80] sm:$0xff] }
 0x344   : > { %2207 = vst.msk [vmem:[%s3981_s28 + $0x20] sm:$0xff] %vm551_vm3, %v2191_v21  ;;  %v2159_v40 = vsel %vm2126_vm9, %v2110_v36, %v2143_v18  ;;  %vm2125_vm10 = vcmp.gt.f32.partialorder %v2109_v16, 0.0  ;;  %v2142_v20 = vmul.f32 %v3974_v63, %v2109_v16  ;;  %v2735_v57 = vpop.f32.mrf.mxu1  ;;  %v2459_v14 = vld [vmem:[%s2952_s9 + $0x98] sm:$0xff] }
 0x345   : > { %v2194_v6 = vadd.f32 %v2451_v47, %v2159_v40  ;;  %vm2128_vm11 = vcmp.gt.f32.partialorder %v2112_v22, 0.0  ;;  %v2145_v32 = vmul.f32 %v3974_v63, %v2112_v22  ;;  %v2111_v4 = vadd.f32 %v2064_v35, %v1911_v24  ;;  %v2769_v31 = vpop.f32.mrf.mxu0  ;;  %v2458_v47 = vld [vmem:[%s2952_s9 + $0x90] sm:$0xff] }
 0x346   : > { %v2158_v13 = vsel %vm2125_vm10, %v2109_v16, %v2142_v20  ;;  %v1926_v29 = vadd.f32 %v2735_v57, %v3960_v62  ;;  %v1920_v43 = vpop.f32.mrf.mxu1 }
 0x347   : > { %2210 = vst.msk [vmem:[%s3981_s28 + $0x38] sm:$0xff] %vm551_vm3, %v2194_v6  ;;  %v2193_v41 = vadd.f32 %v2450_v25, %v2158_v13  ;;  %v2161_v7 = vsel %vm2128_vm11, %v2112_v22, %v2145_v32  ;;  %vm2127_vm12 = vcmp.gt.f32.partialorder %v2111_v4, 0.0  ;;  %v2144_v11 = vmul.f32 %v3974_v63, %v2111_v4  ;;  %v2094_v12 = vpop.f32.mrf.mxu0 }
 0x348   : > { %v2196_v28 = vadd.f32 %v2453_v2, %v2161_v7  ;;  %v2114_v49 = vadd.f32 %v2763_v8, %v1926_v29  ;;  %v1921_v15 = vadd.f32 %v1920_v43, %v3963_v53  ;;  %v2738_v26 = vpop.f32.mrf.mxu1 }
 0x349   : > { %2209 = vst.msk [vmem:[%s3981_s28 + $0x30] sm:$0xff] %vm551_vm3, %v2193_v41  ;;  %v2160_v62 = vsel %vm2127_vm12, %v2111_v4, %v2144_v11  ;;  %v1936_v45 = vadd.f32 %v2738_v26, %v3965_v42 }
 0x34a   : > { %2212 = vst.msk [vmem:[%s3981_s28 + $0x48] sm:$0xff] %vm551_vm3, %v2196_v28  ;;  %v2195_v34 = vadd.f32 %v2452_v51, %v2160_v62  ;;  %vm2130_vm13 = vcmp.gt.f32.partialorder %v2114_v49, 0.0  ;;  %v2147_v44 = vmul.f32 %v3974_v63, %v2114_v49  ;;  %v2113_v56 = vadd.f32 %v2074_v54, %v1921_v15  ;;  %v1930_v1 = vpop.f32.mrf.mxu1 }
 0x34b   : > { %v2116_v3 = vadd.f32 %v2766_v39, %v1936_v45  ;;  %v1931_v53 = vadd.f32 %v1930_v1, %v3967_v33 }
 0x34c   : > { %2211 = vst.msk [vmem:[%s3981_s28 + $0x40] sm:$0xff] %vm551_vm3, %v2195_v34  ;;  %v2163_v48 = vsel %vm2130_vm13, %v2114_v49, %v2147_v44  ;;  %vm2129_vm14 = vcmp.gt.f32.partialorder %v2113_v56, 0.0  ;;  %v2146_v42 = vmul.f32 %v3974_v63, %v2113_v56  ;;  %v2741_v5 = vpop.f32.mrf.mxu1 }
 0x34d   : > { %v2198_v52 = vadd.f32 %v2455_v37, %v2163_v48  ;;  %vm2132_vm15 = vcmp.gt.f32.partialorder %v2116_v3, 0.0  ;;  %v2149_v46 = vmul.f32 %v3974_v63, %v2116_v3  ;;  %v2115_v58 = vadd.f32 %v2084_v38, %v1931_v53 }
 0x34e   : > { %v2162_v33 = vsel %vm2129_vm14, %v2113_v56, %v2146_v42  ;;  %v1946_v17 = vadd.f32 %v2741_v5, %v3969_v30  ;;  %v1940_v35 = vpop.f32.mrf.mxu1 }
 0x34f   : > { %2214 = vst.msk [vmem:[%s3981_s28 + $0x58] sm:$0xff] %vm551_vm3, %v2198_v52  ;;  %v2197_v27 = vadd.f32 %v2454_v55, %v2162_v33  ;;  %v2165_v50 = vsel %vm2132_vm15, %v2116_v3, %v2149_v46  ;;  %vm2131_vm6 = vcmp.gt.f32.partialorder %v2115_v58, 0.0  ;;  %v2148_v59 = vmul.f32 %v3974_v63, %v2115_v58 }
 0x350   : > { %v2200_v19 = vadd.f32 %v2457_v10, %v2165_v50  ;;  %v2118_v36 = vadd.f32 %v2769_v31, %v1946_v17  ;;  %v1941_v9 = vadd.f32 %v1940_v35, %v3971_v61 }
 0x351   : > { %2213 = vst.msk [vmem:[%s3981_s28 + $0x50] sm:$0xff] %vm551_vm3, %v2197_v27  ;;  %v2164_v30 = vsel %vm2131_vm6, %v2115_v58, %v2148_v59 }
 0x352   : > { %2216 = vst.msk [vmem:[%s3981_s28 + $0x68] sm:$0xff] %vm551_vm3, %v2200_v19  ;;  %v2199_v8 = vadd.f32 %v2456_v23, %v2164_v30  ;;  %vm2134_vm7 = vcmp.gt.f32.partialorder %v2118_v36, 0.0  ;;  %v2151_v0 = vmul.f32 %v3974_v63, %v2118_v36  ;;  %v2117_v21 = vadd.f32 %v2094_v12, %v1941_v9 }
 0x354   : > { %2215 = vst.msk [vmem:[%s3981_s28 + $0x60] sm:$0xff] %vm551_vm3, %v2199_v8  ;;  %v2167_v18 = vsel %vm2134_vm7, %v2118_v36, %v2151_v0  ;;  %vm2133_vm0 = vcmp.gt.f32.partialorder %v2117_v21, 0.0  ;;  %v2150_v61 = vmul.f32 %v3974_v63, %v2117_v21 }
 0x355   : > { %v2202_v16 = vadd.f32 %v2459_v14, %v2167_v18 }
 0x356   : > { %v2166_v60 = vsel %vm2133_vm0, %v2117_v21, %v2150_v61 }
 0x357   : > { %2218 = vst.msk [vmem:[%s3981_s28 + $0x78] sm:$0xff] %vm551_vm3, %v2202_v16  ;;  %v2201_v22 = vadd.f32 %v2458_v47, %v2166_v60 }
 0x359   : > { %2217 = vst.msk [vmem:[%s3981_s28 + $0x70] sm:$0xff] %vm551_vm3, %v2201_v22 }
 0x35a PF: > { %s20_s23 = sadd.s32 1, %s2870_s23   ;;  %s4079_s20 = smov %s2862_s22 }
 0x35b   : > { %p17_p0 = scmp.ge.s32.totalorder %s20_s23, 6   ;;  %s4080_s21 = smov %s2866_s0 }
 0x35c   : > { %s4081_s22 = smov %s4084_s24  ;;  %s4082_s0 = smov %s4088_s25 }
 0x35d   :  { %19 = sbr.rel (!%p17_p0) target bundleno = 18 (0x12), region = 64 }

</bundles_post_ra>
